<compile_context>
chip_gen: v7x
topology: tpu7x:2x2x1
jax: 0.10.0
libtpu: 0.0.40
codegen_flags: <defaults>
</compile_context>

<pallas_src>
import functools

import jax
import jax.numpy as jnp
from jax import lax
from jax.experimental import pallas as pl
from jax.experimental.pallas import tpu as pltpu

LANE = 128      # lane-dense output width (zero-padded channels)
_ALIGN = 16     # sublane alignment valid for both f32 (8,128) and bf16 (16,128)


# ----------------------------------------------------------------------------
# Tiling helpers
# ----------------------------------------------------------------------------
def _round_up(v, a):
    return ((v + a - 1) // a) * a


def _choose_tiles(m, *, tm_max=1024, align=_ALIGN):
    """Pick (tile_rows, grid): rows sublane-aligned; >=2 parallel grid steps
    whenever there is enough work so v7x can shard across its 2 TensorCores."""
    if m <= align:
        return _round_up(max(m, 1), align), 1
    grid = max(2, pl.cdiv(m, tm_max))
    tm = _round_up(pl.cdiv(m, grid), align)
    grid = pl.cdiv(m, tm)
    return tm, grid


# ----------------------------------------------------------------------------
# Pallas kernels
# ----------------------------------------------------------------------------
def _conv_pool_kernel(p_ref, w_ref, b_ref, o_ref, *, tm):
    """Fused conv-as-GEMM + bias + ReLU + 2x2 maxpool epilogue.

    p_ref: (4*tm, K)  -- the 4 pool-window patch views stacked along rows
    w_ref: (K, 128)   -- conv weights, output channels zero-padded to 128
    b_ref: (1, 128)   -- bias, zero-padded
    o_ref: (tm, 128)  -- pooled activations (lane-dense store)
    """
    # One long MXU push for all 4 views (avoids 3 extra weight re-pushes).
    y = jnp.dot(p_ref[...], w_ref[...], preferred_element_type=jnp.float32)
    # Free VPU max over the 4 contiguous tm-row groups.
    m = jnp.maximum(jnp.maximum(y[0:tm], y[tm:2 * tm]),
                    jnp.maximum(y[2 * tm:3 * tm], y[3 * tm:4 * tm]))
    # max_v relu(y_v + b) == relu(max_v(y_v) + b)  (shared bias, monotone ReLU)
    o_ref[...] = jnp.maximum(m + b_ref[...], 0.0).astype(o_ref.dtype)


def _mlp_kernel(x_ref, w1_ref, b1_ref, w2_ref, b2_ref, w3_ref, b3_ref, o_ref):
    """Fused fc1+ReLU -> fc2+ReLU -> fc3 (all weights VMEM-resident)."""
    h = jnp.dot(x_ref[...], w1_ref[...], preferred_element_type=jnp.float32)
    h = jnp.maximum(h + b1_ref[...], 0.0)
    h = jnp.dot(h, w2_ref[...], preferred_element_type=jnp.float32)
    h = jnp.maximum(h + b2_ref[...], 0.0)
    h = jnp.dot(h, w3_ref[...], preferred_element_type=jnp.float32)
    o_ref[...] = (h + b3_ref[...]).astype(o_ref.dtype)


# ----------------------------------------------------------------------------
# Kernel wrappers
# ----------------------------------------------------------------------------
def conv_pool(views, w, b, *, out_dtype=jnp.float32, tm_max=1024):
    """views: (4, M, K) pool-window patch views -> (M, 128) pooled output."""
    nv, M, K = views.shape
    n_pad = w.shape[1]

    tm, grid = _choose_tiles(M, tm_max=tm_max)
    m_pad = tm * grid
    if m_pad != M:
        views = jnp.pad(views, ((0, 0), (0, m_pad - M), (0, 0)))

    # (4, m_pad, K) -> (grid, 4, tm, K) -> (grid*4*tm, K): each grid block
    # carries its 4 views contiguously so the kernel runs ONE (4*tm, K) GEMM.
    p = views.reshape(nv, grid, tm, K).transpose(1, 0, 2, 3)
    p = p.reshape(grid * nv * tm, K)

    nbytes = lambda a: a.size * a.dtype.itemsize
    flops = 2 * grid * nv * tm * K * n_pad
    bytes_accessed = (nbytes(p) + nbytes(w) + nbytes(b)
                      + m_pad * n_pad * jnp.dtype(out_dtype).itemsize)

    out = pl.pallas_call(
        functools.partial(_conv_pool_kernel, tm=tm),
        out_shape=jax.ShapeDtypeStruct((m_pad, n_pad), out_dtype),
        grid=(grid,),
        in_specs=[
            pl.BlockSpec((nv * tm, K), lambda i: (i, 0)),
            pl.BlockSpec((K, n_pad), lambda i: (0, 0)),
            pl.BlockSpec((1, n_pad), lambda i: (0, 0)),
        ],
        out_specs=pl.BlockSpec((tm, n_pad), lambda i: (i, 0)),
        compiler_params=pltpu.CompilerParams(
            dimension_semantics=("parallel",),
            vmem_limit_bytes=32 * 1024 * 1024),
        cost_estimate=pl.CostEstimate(flops=flops, transcendentals=0,
                                      bytes_accessed=bytes_accessed),
    )(p, w, b)
    return out[:M] if m_pad != M else out


def mlp(x, w1, b1, w2, b2, w3, b3, *, tm_max=1024):
    """x: (B, 400) -> (B, 128) logits (first 10 columns are the real ones)."""
    M, K = x.shape
    n_pad = w3.shape[1]

    tm, grid = _choose_tiles(M, tm_max=tm_max)
    m_pad = tm * grid
    if m_pad != M:
        x = jnp.pad(x, ((0, m_pad - M), (0, 0)))

    full = lambda i: (0, 0)
    nbytes = lambda a: a.size * a.dtype.itemsize
    flops = 2 * m_pad * (K * w1.shape[1]
                         + w2.shape[0] * w2.shape[1]
                         + w3.shape[0] * w3.shape[1])
    bytes_accessed = (nbytes(x) + nbytes(w1) + nbytes(b1) + nbytes(w2)
                      + nbytes(b2) + nbytes(w3) + nbytes(b3)
                      + m_pad * n_pad * 4)

    out = pl.pallas_call(
        _mlp_kernel,
        out_shape=jax.ShapeDtypeStruct((m_pad, n_pad), jnp.float32),
        grid=(grid,),
        in_specs=[
            pl.BlockSpec((tm, K), lambda i: (i, 0)),
            pl.BlockSpec(w1.shape, full), pl.BlockSpec(b1.shape, full),
            pl.BlockSpec(w2.shape, full), pl.BlockSpec(b2.shape, full),
            pl.BlockSpec(w3.shape, full), pl.BlockSpec(b3.shape, full),
        ],
        out_specs=pl.BlockSpec((tm, n_pad), lambda i: (i, 0)),
        compiler_params=pltpu.CompilerParams(
            dimension_semantics=("parallel",),
            vmem_limit_bytes=32 * 1024 * 1024),
        cost_estimate=pl.CostEstimate(flops=flops, transcendentals=0,
                                      bytes_accessed=bytes_accessed),
    )(x, w1, b1, w2, b2, w3, b3)
    return out[:M] if m_pad != M else out


# ----------------------------------------------------------------------------
# Glue (layout plumbing in plain JAX) -- no intermediate im2col materialized
# ----------------------------------------------------------------------------
def pool_view_patches(x, k, dtype):
    """x: (B, H, W, C) NHWC -> (4, B*Po*Qo, k*k*C) pool-window patch views.

    Builds the 4 (dy, dx) pool-window views of the conv patches directly from
    x with strided slices (fused by XLA); column order is (kh, kw, c) to match
    the prepared conv weights.
    """
    B, H, W, C = x.shape
    Ho, Wo = H - k + 1, W - k + 1
    Po, Qo = Ho // 2, Wo // 2
    views = []
    for dy in (0, 1):
        for dx in (0, 1):
            taps = []
            for kh in range(k):
                for kw in range(k):
                    i0, j0 = dy + kh, dx + kw
                    taps.append(x[:, i0:i0 + 2 * Po:2, j0:j0 + 2 * Qo:2, :])
            v = jnp.concatenate(taps, axis=-1)            # (B, Po, Qo, k*k*C)
            views.append(v.reshape(B * Po * Qo, k * k * C))
    return jnp.stack(views, axis=0).astype(dtype)          # (4, M, K)


# ----------------------------------------------------------------------------
# Parameters (PyTorch layouts) + one-time TPU re-layout / padding
# ----------------------------------------------------------------------------
def init_params(key):
    ks = jax.random.split(key, 10)
    scale = 0.1
    return {
        "conv1_w": scale * jax.random.normal(ks[0], (6, 3, 5, 5), jnp.float32),
        "conv1_b": scale * jax.random.normal(ks[1], (6,), jnp.float32),
        "conv2_w": scale * jax.random.normal(ks[2], (16, 6, 5, 5), jnp.float32),
        "conv2_b": scale * jax.random.normal(ks[3], (16,), jnp.float32),
        "fc1_w": scale * jax.random.normal(ks[4], (120, 16 * 5 * 5), jnp.float32),
        "fc1_b": scale * jax.random.normal(ks[5], (120,), jnp.float32),
        "fc2_w": scale * jax.random.normal(ks[6], (84, 120), jnp.float32),
        "fc2_b": scale * jax.random.normal(ks[7], (84,), jnp.float32),
        "fc3_w": scale * jax.random.normal(ks[8], (10, 84), jnp.float32),
        "fc3_b": scale * jax.random.normal(ks[9], (10,), jnp.float32),
    }


def prepare_params(p):
    """Hoisted out of the forward path: transpose + permute + zero-pad once."""
    def pad_cols(a):
        return jnp.pad(a, ((0, 0), (0, LANE - a.shape[1])))

    def pad_rows_cols(a, rows):
        return jnp.pad(a, ((0, rows - a.shape[0]), (0, LANE - a.shape[1])))

    w1c = jnp.transpose(p["conv1_w"], (2, 3, 1, 0)).reshape(5 * 5 * 3, 6)
    w2c = jnp.transpose(p["conv2_w"], (2, 3, 1, 0)).reshape(5 * 5 * 6, 16)

    # fc1 consumes the conv2 pooled output flattened in (h, w, c) order (the
    # natural kernel-output order); permute the PyTorch (c, h, w)-ordered
    # weight rows once here so no NCHW flatten/transpose is needed at runtime.
    hwc_to_chw = (jnp.arange(16)[None, :] * 25
                  + jnp.arange(25)[:, None]).reshape(-1)      # (400,)
    w1f = p["fc1_w"].T[hwc_to_chw]                            # (400, 120)

    return {
        "conv1_w": pad_cols(w1c),                             # (75, 128)
        "conv1_b": pad_cols(p["conv1_b"].reshape(1, -1)),     # (1, 128)
        "conv2_w": pad_cols(w2c),                             # (150, 128)
        "conv2_b": pad_cols(p["conv2_b"].reshape(1, -1)),     # (1, 128)
        "fc1_w": pad_cols(w1f),                               # (400, 128)
        "fc1_b": pad_cols(p["fc1_b"].reshape(1, -1)),         # (1, 128)
        "fc2_w": pad_rows_cols(p["fc2_w"].T, LANE),           # (128, 128)
        "fc2_b": pad_cols(p["fc2_b"].reshape(1, -1)),         # (1, 128)
        "fc3_w": pad_rows_cols(p["fc3_w"].T, LANE),           # (128, 128)
        "fc3_b": pad_cols(p["fc3_b"].reshape(1, -1)),         # (1, 128)
    }


# ----------------------------------------------------------------------------
# Forward pass
# ----------------------------------------------------------------------------
def net_forward(x_nchw, q, *, conv_dtype=jnp.bfloat16):
    B = x_nchw.shape[0]
    x = jnp.transpose(x_nchw, (0, 2, 3, 1))                  # NCHW -> NHWC

    # conv1 (5x5, 3->6) + ReLU + 2x2 maxpool -> (B,14,14,6)
    v1 = pool_view_patches(x, 5, conv_dtype)                  # (4, B*196, 75)
    a1 = conv_pool(v1, q["conv1_w"].astype(conv_dtype), q["conv1_b"],
                   out_dtype=conv_dtype)                      # (B*196, 128)
    a1 = a1[:, :6].reshape(B, 14, 14, 6)

    # conv2 (5x5, 6->16) + ReLU + 2x2 maxpool -> (B,5,5,16)
    v2 = pool_view_patches(a1, 5, conv_dtype)                 # (4, B*25, 150)
    a2 = conv_pool(v2, q["conv2_w"].astype(conv_dtype), q["conv2_b"],
                   out_dtype=jnp.float32)                     # (B*25, 128)

    # flatten in (h, w, c) order -- fc1 weight rows were permuted to match,
    # so no NCHW transpose is needed here.
    flat = a2.reshape(B, 25, LANE)[:, :, :16].reshape(B, 400)
    flat = flat.astype(jnp.float32)

    # fused fc1 + ReLU + fc2 + ReLU + fc3 (lane-dense padded output)
    out = mlp(flat, q["fc1_w"], q["fc1_b"], q["fc2_w"], q["fc2_b"],
              q["fc3_w"], q["fc3_b"])
    return out[:, :10]                                        # (B, 10)


# ----------------------------------------------------------------------------
# Pure-JAX reference (for correctness spot-checks)
# ----------------------------------------------------------------------------
def reference_forward(x_nchw, p):
    dn = ("NCHW", "OIHW", "NCHW")
    hp = lax.Precision.HIGHEST
    y = lax.conv_general_dilated(x_nchw, p["conv1_w"], (1, 1), "VALID",
                                 dimension_numbers=dn, precision=hp)
    y = jax.nn.relu(y + p["conv1_b"].reshape(1, -1, 1, 1))
    y = lax.reduce_window(y, -jnp.inf, lax.max, (1, 1, 2, 2), (1, 1, 2, 2), "VALID")
    y = lax.conv_general_dilated(y, p["conv2_w"], (1, 1), "VALID",
                                 dimension_numbers=dn, precision=hp)
    y = jax.nn.relu(y + p["conv2_b"].reshape(1, -1, 1, 1))
    y = lax.reduce_window(y, -jnp.inf, lax.max, (1, 1, 2, 2), (1, 1, 2, 2), "VALID")
    y = y.reshape(y.shape[0], -1)
    y = jax.nn.relu(jnp.dot(y, p["fc1_w"].T, precision=hp) + p["fc1_b"])
    y = jax.nn.relu(jnp.dot(y, p["fc2_w"].T, precision=hp) + p["fc2_b"])
    return jnp.dot(y, p["fc3_w"].T, precision=hp) + p["fc3_b"]


# ----------------------------------------------------------------------------
if __name__ == "__main__":
    key = jax.random.PRNGKey(0)
    k_params, k_input = jax.random.split(key)

    params = init_params(k_params)
    prepared = prepare_params(params)          # one-time weight re-layout

    # CIFAR-10 input: batch=2, NCHW (2, 3, 32, 32) — spatial 32 is required by
    # the module's fc1 = 16*5*5.
    x = jax.random.normal(k_input, (2, 3, 32, 32), jnp.float32)

    fwd_bf16 = jax.jit(functools.partial(net_forward, conv_dtype=jnp.bfloat16))
    fwd_f32 = jax.jit(functools.partial(net_forward, conv_dtype=jnp.float32))

    out = jax.block_until_ready(fwd_bf16(x, prepared))
    assert out.shape == (2, 10), out.shape
    assert bool(jnp.all(jnp.isfinite(out)))

    ref = jax.block_until_ready(jax.jit(reference_forward)(x, params))

    # Structural exactness: f32 conv path vs HIGHEST-precision XLA reference.
    out_f32 = jax.block_until_ready(fwd_f32(x, prepared))
    err_f32 = float(jnp.max(jnp.abs(out_f32 - ref)))
    assert err_f32 < 2e-3, f"f32 path mismatch vs reference: {err_f32}"

    # bf16 conv patches/weights (perf default): looser tolerance for the
    # bf16 input quantization (estimated logit error ~1e-2).
    err_bf16 = float(jnp.max(jnp.abs(out - ref)))
    assert err_bf16 < 5e-2, f"bf16 path mismatch vs reference: {err_bf16}"

    print("KERNEL_OK")
</pallas_src>

<mosaic_0001>
module attributes {stable_mosaic.version = 11 : i64} {
  func.func @_conv_pool_kernel(%arg0: i32, %arg1: memref<832x75xbf16, #tpu.memory_space<vmem>>, %arg2: memref<75x128xbf16, #tpu.memory_space<vmem>>, %arg3: memref<1x128xf32, #tpu.memory_space<vmem>>, %arg4: memref<208x128xbf16, #tpu.memory_space<vmem>>) attributes {dimension_semantics = [#tpu.dimension_semantics<parallel>], iteration_bounds = array<i64: 2>, scalar_prefetch = 0 : i64, scratch_operands = 0 : i64, tpu.core_type = #tpu.core_type<tc>, window_params = [{transform_indices = @transform_0, window_bounds = array<i64: 832, 75>}, {pipeline_mode = #tpu.pipeline_mode<synchronous>, transform_indices = @transform_1, window_bounds = array<i64: 75, 128>}, {pipeline_mode = #tpu.pipeline_mode<synchronous>, transform_indices = @transform_2, window_bounds = array<i64: 1, 128>}, {transform_indices = @transform_3, window_bounds = array<i64: 208, 128>}]} {
    %c0 = arith.constant 0 : index
    %c0_0 = arith.constant 0 : index
    %0 = vector.load %arg1[%c0, %c0_0] : memref<832x75xbf16, #tpu.memory_space<vmem>>, vector<832x75xbf16>
    %c0_1 = arith.constant 0 : index
    %c0_2 = arith.constant 0 : index
    %1 = vector.load %arg2[%c0_1, %c0_2] : memref<75x128xbf16, #tpu.memory_space<vmem>>, vector<75x128xbf16>
    %cst = arith.constant dense<0.000000e+00> : vector<832x128xf32>
    %2 = tpu.matmul %0, %1, %cst {dimension_numbers = #tpu.dot_dimension_numbers<[1], [0], [0], [1], [0, 0, 1, 1], [], []>} : vector<832x75xbf16>, vector<75x128xbf16>, vector<832x128xf32> -> vector<832x128xf32>
    %3 = vector.extract_strided_slice %2 {offsets = [0, 0], sizes = [208, 128], strides = [1, 1]} : vector<832x128xf32> to vector<208x128xf32>
    %4 = vector.extract_strided_slice %2 {offsets = [208, 0], sizes = [208, 128], strides = [1, 1]} : vector<832x128xf32> to vector<208x128xf32>
    %5 = arith.maximumf %3, %4 : vector<208x128xf32>
    %6 = vector.extract_strided_slice %2 {offsets = [416, 0], sizes = [208, 128], strides = [1, 1]} : vector<832x128xf32> to vector<208x128xf32>
    %7 = vector.extract_strided_slice %2 {offsets = [624, 0], sizes = [208, 128], strides = [1, 1]} : vector<832x128xf32> to vector<208x128xf32>
    %8 = arith.maximumf %6, %7 : vector<208x128xf32>
    %9 = arith.maximumf %5, %8 : vector<208x128xf32>
    %c0_3 = arith.constant 0 : index
    %c0_4 = arith.constant 0 : index
    %10 = vector.load %arg3[%c0_3, %c0_4] : memref<1x128xf32, #tpu.memory_space<vmem>>, vector<1x128xf32>
    %11 = vector.broadcast %10 : vector<1x128xf32> to vector<208x128xf32>
    %12 = arith.addf %9, %11 : vector<208x128xf32>
    %cst_5 = arith.constant 0.000000e+00 : f32
    %13 = vector.broadcast %cst_5 : f32 to vector<208x128xf32>
    %14 = arith.maximumf %12, %13 : vector<208x128xf32>
    %15 = arith.truncf %14 : vector<208x128xf32> to vector<208x128xbf16>
    %c0_6 = arith.constant 0 : index
    %c0_7 = arith.constant 0 : index
    %16 = vector.load %arg4[%c0_6, %c0_7] : memref<208x128xbf16, #tpu.memory_space<vmem>>, vector<208x128xbf16>
    tpu.vector_store %arg4[%c0_6, %c0_7], %15 {strides = array<i32>} : memref<208x128xbf16, #tpu.memory_space<vmem>>, vector<208x128xbf16>,
    return
  }
  func.func @transform_0(%arg0: i32) -> (i32, i32) {
    %c0_i32 = arith.constant 0 : i32
    %c0_i32_0 = arith.constant 0 : i32
    return %arg0, %c0_i32 : i32, i32
  }
  func.func @transform_1(%arg0: i32) -> (i32, i32) {
    %c0_i32 = arith.constant 0 : i32
    %c0_i32_0 = arith.constant 0 : i32
    %c0_i32_1 = arith.constant 0 : i32
    return %c0_i32, %c0_i32_0 : i32, i32
  }
  func.func @transform_2(%arg0: i32) -> (i32, i32) {
    %c0_i32 = arith.constant 0 : i32
    %c0_i32_0 = arith.constant 0 : i32
    %c0_i32_1 = arith.constant 0 : i32
    return %c0_i32, %c0_i32_0 : i32, i32
  }
  func.func @transform_3(%arg0: i32) -> (i32, i32) {
    %c0_i32 = arith.constant 0 : i32
    %c0_i32_0 = arith.constant 0 : i32
    return %arg0, %c0_i32 : i32, i32
  }
}

module attributes {stable_mosaic.version = 11 : i64} {
  func.func @_conv_pool_kernel(%arg0: i32, %arg1: memref<128x150xbf16, #tpu.memory_space<vmem>>, %arg2: memref<150x128xbf16, #tpu.memory_space<vmem>>, %arg3: memref<1x128xf32, #tpu.memory_space<vmem>>, %arg4: memref<32x128xf32, #tpu.memory_space<vmem>>) attributes {dimension_semantics = [#tpu.dimension_semantics<parallel>], iteration_bounds = array<i64: 2>, scalar_prefetch = 0 : i64, scratch_operands = 0 : i64, tpu.core_type = #tpu.core_type<tc>, window_params = [{transform_indices = @transform_0, window_bounds = array<i64: 128, 150>}, {pipeline_mode = #tpu.pipeline_mode<synchronous>, transform_indices = @transform_1, window_bounds = array<i64: 150, 128>}, {pipeline_mode = #tpu.pipeline_mode<synchronous>, transform_indices = @transform_2, window_bounds = array<i64: 1, 128>}, {transform_indices = @transform_3, window_bounds = array<i64: 32, 128>}]} {
    %c0 = arith.constant 0 : index
    %c0_0 = arith.constant 0 : index
    %0 = vector.load %arg1[%c0, %c0_0] : memref<128x150xbf16, #tpu.memory_space<vmem>>, vector<128x150xbf16>
    %c0_1 = arith.constant 0 : index
    %c0_2 = arith.constant 0 : index
    %1 = vector.load %arg2[%c0_1, %c0_2] : memref<150x128xbf16, #tpu.memory_space<vmem>>, vector<150x128xbf16>
    %cst = arith.constant dense<0.000000e+00> : vector<128x128xf32>
    %2 = tpu.matmul %0, %1, %cst {dimension_numbers = #tpu.dot_dimension_numbers<[1], [0], [0], [1], [0, 0, 1, 1], [], []>} : vector<128x150xbf16>, vector<150x128xbf16>, vector<128x128xf32> -> vector<128x128xf32>
    %3 = vector.extract_strided_slice %2 {offsets = [0, 0], sizes = [32, 128], strides = [1, 1]} : vector<128x128xf32> to vector<32x128xf32>
    %4 = vector.extract_strided_slice %2 {offsets = [32, 0], sizes = [32, 128], strides = [1, 1]} : vector<128x128xf32> to vector<32x128xf32>
    %5 = arith.maximumf %3, %4 : vector<32x128xf32>
    %6 = vector.extract_strided_slice %2 {offsets = [64, 0], sizes = [32, 128], strides = [1, 1]} : vector<128x128xf32> to vector<32x128xf32>
    %7 = vector.extract_strided_slice %2 {offsets = [96, 0], sizes = [32, 128], strides = [1, 1]} : vector<128x128xf32> to vector<32x128xf32>
    %8 = arith.maximumf %6, %7 : vector<32x128xf32>
    %9 = arith.maximumf %5, %8 : vector<32x128xf32>
    %c0_3 = arith.constant 0 : index
    %c0_4 = arith.constant 0 : index
    %10 = vector.load %arg3[%c0_3, %c0_4] : memref<1x128xf32, #tpu.memory_space<vmem>>, vector<1x128xf32>
    %11 = vector.broadcast %10 : vector<1x128xf32> to vector<32x128xf32>
    %12 = arith.addf %9, %11 : vector<32x128xf32>
    %cst_5 = arith.constant 0.000000e+00 : f32
    %13 = vector.broadcast %cst_5 : f32 to vector<32x128xf32>
    %14 = arith.maximumf %12, %13 : vector<32x128xf32>
    %c0_6 = arith.constant 0 : index
    %c0_7 = arith.constant 0 : index
    %15 = vector.load %arg4[%c0_6, %c0_7] : memref<32x128xf32, #tpu.memory_space<vmem>>, vector<32x128xf32>
    tpu.vector_store %arg4[%c0_6, %c0_7], %14 {strides = array<i32>} : memref<32x128xf32, #tpu.memory_space<vmem>>, vector<32x128xf32>,
    return
  }
  func.func @transform_0(%arg0: i32) -> (i32, i32) {
    %c0_i32 = arith.constant 0 : i32
    %c0_i32_0 = arith.constant 0 : i32
    return %arg0, %c0_i32 : i32, i32
  }
  func.func @transform_1(%arg0: i32) -> (i32, i32) {
    %c0_i32 = arith.constant 0 : i32
    %c0_i32_0 = arith.constant 0 : i32
    %c0_i32_1 = arith.constant 0 : i32
    return %c0_i32, %c0_i32_0 : i32, i32
  }
  func.func @transform_2(%arg0: i32) -> (i32, i32) {
    %c0_i32 = arith.constant 0 : i32
    %c0_i32_0 = arith.constant 0 : i32
    %c0_i32_1 = arith.constant 0 : i32
    return %c0_i32, %c0_i32_0 : i32, i32
  }
  func.func @transform_3(%arg0: i32) -> (i32, i32) {
    %c0_i32 = arith.constant 0 : i32
    %c0_i32_0 = arith.constant 0 : i32
    return %arg0, %c0_i32 : i32, i32
  }
}

module attributes {stable_mosaic.version = 11 : i64} {
  func.func @_mlp_kernel(%arg0: i32, %arg1: memref<16x400xf32, #tpu.memory_space<vmem>>, %arg2: memref<400x128xf32, #tpu.memory_space<vmem>>, %arg3: memref<1x128xf32, #tpu.memory_space<vmem>>, %arg4: memref<128x128xf32, #tpu.memory_space<vmem>>, %arg5: memref<1x128xf32, #tpu.memory_space<vmem>>, %arg6: memref<128x128xf32, #tpu.memory_space<vmem>>, %arg7: memref<1x128xf32, #tpu.memory_space<vmem>>, %arg8: memref<16x128xf32, #tpu.memory_space<vmem>>) attributes {dimension_semantics = [#tpu.dimension_semantics<parallel>], iteration_bounds = array<i64: 1>, scalar_prefetch = 0 : i64, scratch_operands = 0 : i64, tpu.core_type = #tpu.core_type<tc>, window_params = [{transform_indices = @transform_0, window_bounds = array<i64: 16, 400>}, {pipeline_mode = #tpu.pipeline_mode<synchronous>, transform_indices = @transform_1, window_bounds = array<i64: 400, 128>}, {pipeline_mode = #tpu.pipeline_mode<synchronous>, transform_indices = @transform_2, window_bounds = array<i64: 1, 128>}, {pipeline_mode = #tpu.pipeline_mode<synchronous>, transform_indices = @transform_3, window_bounds = array<i64: 128, 128>}, {pipeline_mode = #tpu.pipeline_mode<synchronous>, transform_indices = @transform_4, window_bounds = array<i64: 1, 128>}, {pipeline_mode = #tpu.pipeline_mode<synchronous>, transform_indices = @transform_5, window_bounds = array<i64: 128, 128>}, {pipeline_mode = #tpu.pipeline_mode<synchronous>, transform_indices = @transform_6, window_bounds = array<i64: 1, 128>}, {transform_indices = @transform_7, window_bounds = array<i64: 16, 128>}]} {
    %c0 = arith.constant 0 : index
    %c0_0 = arith.constant 0 : index
    %0 = vector.load %arg1[%c0, %c0_0] : memref<16x400xf32, #tpu.memory_space<vmem>>, vector<16x400xf32>
    %c0_1 = arith.constant 0 : index
    %c0_2 = arith.constant 0 : index
    %1 = vector.load %arg2[%c0_1, %c0_2] : memref<400x128xf32, #tpu.memory_space<vmem>>, vector<400x128xf32>
    %cst = arith.constant dense<0.000000e+00> : vector<16x128xf32>
    %2 = tpu.matmul %0, %1, %cst {dimension_numbers = #tpu.dot_dimension_numbers<[1], [0], [0], [1], [0, 0, 1, 1], [], []>} : vector<16x400xf32>, vector<400x128xf32>, vector<16x128xf32> -> vector<16x128xf32>
    %c0_3 = arith.constant 0 : index
    %c0_4 = arith.constant 0 : index
    %3 = vector.load %arg3[%c0_3, %c0_4] : memref<1x128xf32, #tpu.memory_space<vmem>>, vector<1x128xf32>
    %4 = vector.broadcast %3 : vector<1x128xf32> to vector<16x128xf32>
    %5 = arith.addf %2, %4 : vector<16x128xf32>
    %cst_5 = arith.constant 0.000000e+00 : f32
    %6 = vector.broadcast %cst_5 : f32 to vector<16x128xf32>
    %7 = arith.maximumf %5, %6 : vector<16x128xf32>
    %c0_6 = arith.constant 0 : index
    %c0_7 = arith.constant 0 : index
    %8 = vector.load %arg4[%c0_6, %c0_7] : memref<128x128xf32, #tpu.memory_space<vmem>>, vector<128x128xf32>
    %cst_8 = arith.constant dense<0.000000e+00> : vector<16x128xf32>
    %9 = tpu.matmul %7, %8, %cst_8 {dimension_numbers = #tpu.dot_dimension_numbers<[1], [0], [0], [1], [0, 0, 1, 1], [], []>} : vector<16x128xf32>, vector<128x128xf32>, vector<16x128xf32> -> vector<16x128xf32>
    %c0_9 = arith.constant 0 : index
    %c0_10 = arith.constant 0 : index
    %10 = vector.load %arg5[%c0_9, %c0_10] : memref<1x128xf32, #tpu.memory_space<vmem>>, vector<1x128xf32>
    %11 = vector.broadcast %10 : vector<1x128xf32> to vector<16x128xf32>
    %12 = arith.addf %9, %11 : vector<16x128xf32>
    %cst_11 = arith.constant 0.000000e+00 : f32
    %13 = vector.broadcast %cst_11 : f32 to vector<16x128xf32>
    %14 = arith.maximumf %12, %13 : vector<16x128xf32>
    %c0_12 = arith.constant 0 : index
    %c0_13 = arith.constant 0 : index
    %15 = vector.load %arg6[%c0_12, %c0_13] : memref<128x128xf32, #tpu.memory_space<vmem>>, vector<128x128xf32>
    %cst_14 = arith.constant dense<0.000000e+00> : vector<16x128xf32>
    %16 = tpu.matmul %14, %15, %cst_14 {dimension_numbers = #tpu.dot_dimension_numbers<[1], [0], [0], [1], [0, 0, 1, 1], [], []>} : vector<16x128xf32>, vector<128x128xf32>, vector<16x128xf32> -> vector<16x128xf32>
    %c0_15 = arith.constant 0 : index
    %c0_16 = arith.constant 0 : index
    %17 = vector.load %arg7[%c0_15, %c0_16] : memref<1x128xf32, #tpu.memory_space<vmem>>, vector<1x128xf32>
    %18 = vector.broadcast %17 : vector<1x128xf32> to vector<16x128xf32>
    %19 = arith.addf %16, %18 : vector<16x128xf32>
    %c0_17 = arith.constant 0 : index
    %c0_18 = arith.constant 0 : index
    %20 = vector.load %arg8[%c0_17, %c0_18] : memref<16x128xf32, #tpu.memory_space<vmem>>, vector<16x128xf32>
    tpu.vector_store %arg8[%c0_17, %c0_18], %19 {strides = array<i32>} : memref<16x128xf32, #tpu.memory_space<vmem>>, vector<16x128xf32>,
    return
  }
  func.func @transform_0(%arg0: i32) -> (i32, i32) {
    %c0_i32 = arith.constant 0 : i32
    %c0_i32_0 = arith.constant 0 : i32
    return %arg0, %c0_i32 : i32, i32
  }
  func.func @transform_1(%arg0: i32) -> (i32, i32) {
    %c0_i32 = arith.constant 0 : i32
    %c0_i32_0 = arith.constant 0 : i32
    %c0_i32_1 = arith.constant 0 : i32
    return %c0_i32, %c0_i32_0 : i32, i32
  }
  func.func @transform_2(%arg0: i32) -> (i32, i32) {
    %c0_i32 = arith.constant 0 : i32
    %c0_i32_0 = arith.constant 0 : i32
    %c0_i32_1 = arith.constant 0 : i32
    return %c0_i32, %c0_i32_0 : i32, i32
  }
  func.func @transform_3(%arg0: i32) -> (i32, i32) {
    %c0_i32 = arith.constant 0 : i32
    %c0_i32_0 = arith.constant 0 : i32
    %c0_i32_1 = arith.constant 0 : i32
    return %c0_i32, %c0_i32_0 : i32, i32
  }
  func.func @transform_4(%arg0: i32) -> (i32, i32) {
    %c0_i32 = arith.constant 0 : i32
    %c0_i32_0 = arith.constant 0 : i32
    %c0_i32_1 = arith.constant 0 : i32
    return %c0_i32, %c0_i32_0 : i32, i32
  }
  func.func @transform_5(%arg0: i32) -> (i32, i32) {
    %c0_i32 = arith.constant 0 : i32
    %c0_i32_0 = arith.constant 0 : i32
    %c0_i32_1 = arith.constant 0 : i32
    return %c0_i32, %c0_i32_0 : i32, i32
  }
  func.func @transform_6(%arg0: i32) -> (i32, i32) {
    %c0_i32 = arith.constant 0 : i32
    %c0_i32_0 = arith.constant 0 : i32
    %c0_i32_1 = arith.constant 0 : i32
    return %c0_i32, %c0_i32_0 : i32, i32
  }
  func.func @transform_7(%arg0: i32) -> (i32, i32) {
    %c0_i32 = arith.constant 0 : i32
    %c0_i32_0 = arith.constant 0 : i32
    return %arg0, %c0_i32 : i32, i32
  }
}

</mosaic_0001>

<bundles_post_ra>
// kernel: net_forward.3
= control target key start
LH: loop header
LB: loop body
LE: loop exit
PB: predicated region body
PF: predicated region fallthrough
CT: control target
= control target key end

     0   :  { %s2038_s12 = smov 0   ;;  %s2370_s0 = inlined_call_operand.vmem [shape: bf16[1664,75], index: 0, kind: input, shape index: {}]   ;;  %s2371_s1 = inlined_call_operand.vmem [shape: bf16[75,128], index: 1, kind: input, shape index: {}]   ;;  %s2372_s2 = inlined_call_operand.vmem [shape: f32[1,128], index: 2, kind: input, shape index: {}]   ;;  %s2373_s3 = inlined_call_operand.vmem [shape: bf16[416,128], index: 3, kind: output, shape index: {}]  }
   0x1 LB: > { %s1514_s13 = sadd.s32 4294967295, %s2015_s12   ;;  %p1518_p0 = scmp.ge.s32.totalorder %s2015_s12, 1  ;;  %s2015_s12 = sphi %s2038_s12, %s13_s12  }
   0x2   : > { %p138_p1 = scmp.lt.s32.totalorder %s2015_s12, 3 }
   0x4   : > { %p139_p2 = pnand %p1518_p0, %p138_p1 }
   0x6   : > { %142 = sbr.rel (%p139_p2) target bundleno = 356 (0x164), region = 32 }
   0xd   : > { %v1952_v0 = vld [vmem:[%s2371_s1] sm:$0xff]   ;;  %v1953_v1 = vld [vmem:[%s2371_s1 + $0x8] sm:$0xff]   ;;  %vm735_vm0 = vcmask 1044480   ;;  %v1954_v2 = vld [vmem:[%s2371_s1 + $0x10] sm:$0xff]   ;;  %s162_s20 = smul.u32 104, %s1514_s13  ;;  %vm736_vm1 = vcmask 1045504  }
   0xe   : > { %1819 = vmatprep.subr.bf16.mxu0 %v1952_v0  ;;  %1933 = vmatprep.subr.bf16.mxu1 %v1952_v0  ;;  %v2017_v3 = vmov 65535   ;;  %v1955_v5 = vld [vmem:[%s2371_s1 + $0x18] sm:$0xff]   ;;  %v1956_v6 = vld [vmem:[%s2371_s1 + $0x20] sm:$0x3f]   ;;  %vm578_vm2 = vcmask 613376   ;;  %s168_s29 = smul.u32 26, %s1514_s13 }
   0xf   : > { %1820 = vmatpush3.bf16.msra.mxu0 %v1952_v0  ;;  %1938 = vmatpush3.bf16.msra.mxu1 %v1952_v0  ;;  %v737_v4 = vsel %vm735_vm0, 4294967295, %v2017_v3  ;;  %p163_p3 = scmp.lt.s32.totalorder %s162_s20, 207 }
  0x10   : > { %1821 = vmatprep.subr.bf16.mxu0 %v1953_v1  ;;  %1934 = vmatprep.subr.bf16.mxu1 %v1953_v1  ;;  %v738_v7 = vsel %vm736_vm1, %v737_v4, 0  ;;  %p169_p4 = scmp.lt.s32.totalorder %s168_s29, 51 }
  0x11   : > { %s2379_s20 = smov (!%p163_p3, %s162_s20), 207  ;;  %v740_v8 = vand.u32 %v1956_v6, %v738_v7 }
  0x12   : > { %s1519_s25 = sshll.u32 %s2379_s20, 2  ;;  %s2381_s29 = smov (!%p169_p4, %s168_s29), 51 }
  0x13   : > { %1822 = vmatpush3.bf16.msra.mxu0 %v1953_v1  ;;  %1939 = vmatpush3.bf16.msra.mxu1 %v1953_v1  ;;  %s2066_s28 = scalar_lea.vmem %s2370_s0, %s1519_s25  ;;  %s1520_s5 = sshll.u32 %s2381_s29, 2 }
  0x14   : > { %1823 = vmatprep.subr.bf16.mxu0 %v1954_v2  ;;  %1935 = vmatprep.subr.bf16.mxu1 %v1954_v2  ;;  %v1957_v9 = vld [vmem:[%s2066_s28] sm:$0xff]   ;;  %v1958_v10 = vld [vmem:[%s2066_s28 + $0xd0] sm:$0xff]   ;;  %v1959_v11 = vld [vmem:[%s2066_s28 + $0x8] sm:$0xff]   ;;  %s2282_s8 = scalar_lea.vmem %s2373_s3, %s1520_s5 }
  0x15   : > { %1829 = vmatprep.mubr.msk.bf16.mxu0 %vm578_vm2, %v1957_v9  ;;  %1881 = vmatprep.mubr.msk.bf16.mxu1 %vm578_vm2, %v1958_v10  ;;  %v1960_v12 = vld [vmem:[%s2066_s28 + $0xd8] sm:$0xff]   ;;  %v1961_v13 = vld [vmem:[%s2066_s28 + $0x10] sm:$0xff]   ;;  %v1962_v14 = vld [vmem:[%s2066_s28 + $0xe0] sm:$0xff]  }
  0x16   : > { %v1963_v15 = vld [vmem:[%s2066_s28 + $0x18] sm:$0xff]   ;;  %v1964_v16 = vld [vmem:[%s2066_s28 + $0xe8] sm:$0xff]   ;;  %v1965_v17 = vld [vmem:[%s2066_s28 + $0x20] sm:$0xff]  }
  0x17   : > { %1824 = vmatpush3.bf16.msra.mxu0 %v1954_v2  ;;  %1940 = vmatpush3.bf16.msra.mxu1 %v1954_v2  ;;  %v1966_v18 = vld [vmem:[%s2066_s28 + $0xf0] sm:$0xff]   ;;  %v1967_v19 = vld [vmem:[%s2066_s28 + $0x28] sm:$0xff]   ;;  %v1968_v20 = vld [vmem:[%s2066_s28 + $0xf8] sm:$0xff]  }
  0x18   : > { %1825 = vmatprep.subr.bf16.mxu0 %v1955_v5  ;;  %1936 = vmatprep.subr.bf16.mxu1 %v1955_v5  ;;  %v1969_v21 = vld [vmem:[%s2066_s28 + $0x30] sm:$0xff]   ;;  %v1970_v22 = vld [vmem:[%s2066_s28 + $0x100] sm:$0xff]   ;;  %v1971_v23 = vld [vmem:[%s2066_s28 + $0x38] sm:$0xff]  }
  0x19   : > { %v1972_v24 = vld [vmem:[%s2066_s28 + $0x108] sm:$0xff]   ;;  %v1973_v25 = vld [vmem:[%s2066_s28 + $0x40] sm:$0xff]   ;;  %v1974_v26 = vld [vmem:[%s2066_s28 + $0x110] sm:$0xff]  }
  0x1a   : > { %v1975_v27 = vld [vmem:[%s2066_s28 + $0x48] sm:$0xff]   ;;  %v1976_v28 = vld [vmem:[%s2066_s28 + $0x118] sm:$0xff]   ;;  %v1977_v29 = vld [vmem:[%s2066_s28 + $0x50] sm:$0xff]  }
  0x1b   : > { %1826 = vmatpush3.bf16.msra.mxu0 %v1955_v5  ;;  %1941 = vmatpush3.bf16.msra.mxu1 %v1955_v5  ;;  %v1978_v30 = vld [vmem:[%s2066_s28 + $0x120] sm:$0xff]   ;;  %v1979_v31 = vld [vmem:[%s2066_s28 + $0x58] sm:$0xff]   ;;  %v1980_v32 = vld [vmem:[%s2066_s28 + $0x128] sm:$0xff]  }
  0x1c   : > { %1827 = vmatprep.subr.bf16.mxu0 %v740_v8  ;;  %1937 = vmatprep.subr.bf16.mxu1 %v740_v8  ;;  %v1981_v33 = vld [vmem:[%s2066_s28 + $0x60] sm:$0xff]   ;;  %v1982_v34 = vld [vmem:[%s2066_s28 + $0x130] sm:$0xff]   ;;  %v1983_v35 = vld [vmem:[%s2066_s28 + $0x68] sm:$0xff]  }
  0x1d   : > { %v1984_v36 = vld [vmem:[%s2066_s28 + $0x138] sm:$0xff]   ;;  %v1985_v37 = vld [vmem:[%s2066_s28 + $0x70] sm:$0xff]   ;;  %v1986_v38 = vld [vmem:[%s2066_s28 + $0x140] sm:$0xff]  }
  0x1e   : > { %v1987_v39 = vld [vmem:[%s2066_s28 + $0x78] sm:$0xff]   ;;  %v1988_v40 = vld [vmem:[%s2066_s28 + $0x148] sm:$0xff]   ;;  %v1989_v41 = vld [vmem:[%s2066_s28 + $0x80] sm:$0xff]  }
  0x1f   : > { %1828 = vmatpush3.bf16.msra.mxu0 %v740_v8  ;;  %1942 = vmatpush3.bf16.msra.mxu1 %v740_v8  ;;  %v1990_v42 = vld [vmem:[%s2066_s28 + $0x150] sm:$0xff]   ;;  %v1991_v43 = vld [vmem:[%s2066_s28 + $0x88] sm:$0xff]   ;;  %v1992_v44 = vld [vmem:[%s2066_s28 + $0x158] sm:$0xff]  }
  0x20   : > { %v1993_v45 = vld [vmem:[%s2066_s28 + $0x90] sm:$0xff]   ;;  %v1994_v46 = vld [vmem:[%s2066_s28 + $0x160] sm:$0xff]   ;;  %v1995_v47 = vld [vmem:[%s2066_s28 + $0x98] sm:$0xff]  }
  0x21   : > { %v1996_v48 = vld [vmem:[%s2066_s28 + $0x168] sm:$0xff]   ;;  %v1997_v49 = vld [vmem:[%s2066_s28 + $0xa0] sm:$0xff]   ;;  %v1998_v50 = vld [vmem:[%s2066_s28 + $0x170] sm:$0xff]  }
  0x22   : > { %1830 = vmatmul.mubr.msk.bf16.vlgmr.msra.gmra.mrb[0].mxu0 %vm578_vm2, %v1959_v11  ;;  %1882 = vmatmul.mubr.msk.bf16.vlgmr.msra.gmra.mrb[0].mxu1 %vm578_vm2, %v1960_v12  ;;  %v1999_v51 = vld [vmem:[%s2066_s28 + $0xa8] sm:$0xff]   ;;  %v2000_v52 = vld [vmem:[%s2066_s28 + $0x178] sm:$0xff]   ;;  %v2001_v53 = vld [vmem:[%s2066_s28 + $0xb0] sm:$0xff]  }
  0x23   : > { %1833 = vmatprep.mubr.msk.bf16.mxu0 %vm578_vm2, %v1961_v13  ;;  %1885 = vmatprep.mubr.msk.bf16.mxu1 %vm578_vm2, %v1962_v14  ;;  %v2002_v54 = vld [vmem:[%s2066_s28 + $0x180] sm:$0xff]   ;;  %v2003_v55 = vld [vmem:[%s2066_s28 + $0xb8] sm:$0xff]   ;;  %v2004_v56 = vld [vmem:[%s2066_s28 + $0x188] sm:$0xff]  }
  0x24   : > { %v2005_v57 = vld [vmem:[%s2066_s28 + $0xc0] sm:$0xff]   ;;  %v2006_v58 = vld [vmem:[%s2066_s28 + $0x190] sm:$0xff]   ;;  %v2007_v59 = vld [vmem:[%s2066_s28 + $0xc8] sm:$0xff]  }
  0x25   : > { %v2008_v60 = vld [vmem:[%s2066_s28 + $0x198] sm:$0xff]  }
  0x2a   : > { %1834 = vmatmul.mubr.msk.bf16.gmra.mrb[4].mxu0 %vm578_vm2, %v1963_v15  ;;  %1886 = vmatmul.mubr.msk.bf16.gmra.mrb[4].mxu1 %vm578_vm2, %v1964_v16 }
  0x2b   : > { %1837 = vmatprep.mubr.msk.bf16.mxu0 %vm578_vm2, %v1965_v17  ;;  %1889 = vmatprep.mubr.msk.bf16.mxu1 %vm578_vm2, %v1966_v18 }
  0x32   : > { %1838 = vmatmul.mubr.msk.bf16.gmra.mrb[8].mxu0 %vm578_vm2, %v1967_v19  ;;  %1890 = vmatmul.mubr.msk.bf16.gmra.mrb[8].mxu1 %vm578_vm2, %v1968_v20 }
  0x33   : > { %1841 = vmatprep.mubr.msk.bf16.mxu0 %vm578_vm2, %v1969_v21  ;;  %1893 = vmatprep.mubr.msk.bf16.mxu1 %vm578_vm2, %v1970_v22 }
  0x3a   : > { %1842 = vmatmul.mubr.msk.bf16.gmra.mrb[12].mxu0 %vm578_vm2, %v1971_v23  ;;  %1894 = vmatmul.mubr.msk.bf16.gmra.mrb[12].mxu1 %vm578_vm2, %v1972_v24 }
  0x3b   : > { %1845 = vmatprep.mubr.msk.bf16.mxu0 %vm578_vm2, %v1973_v25  ;;  %1897 = vmatprep.mubr.msk.bf16.mxu1 %vm578_vm2, %v1974_v26 }
  0x42   : > { %1846 = vmatmul.mubr.msk.bf16.gmra.mrb[16].mxu0 %vm578_vm2, %v1975_v27  ;;  %1898 = vmatmul.mubr.msk.bf16.gmra.mrb[16].mxu1 %vm578_vm2, %v1976_v28 }
  0x43   : > { %1849 = vmatprep.mubr.msk.bf16.mxu0 %vm578_vm2, %v1977_v29  ;;  %1901 = vmatprep.mubr.msk.bf16.mxu1 %vm578_vm2, %v1978_v30 }
  0x4a   : > { %1850 = vmatmul.mubr.msk.bf16.gmra.mrb[20].mxu0 %vm578_vm2, %v1979_v31  ;;  %1902 = vmatmul.mubr.msk.bf16.gmra.mrb[20].mxu1 %vm578_vm2, %v1980_v32 }
  0x4b   : > { %1853 = vmatprep.mubr.msk.bf16.mxu0 %vm578_vm2, %v1981_v33  ;;  %1905 = vmatprep.mubr.msk.bf16.mxu1 %vm578_vm2, %v1982_v34 }
  0x52   : > { %1854 = vmatmul.mubr.msk.bf16.gmra.mrb[24].mxu0 %vm578_vm2, %v1983_v35  ;;  %1906 = vmatmul.mubr.msk.bf16.gmra.mrb[24].mxu1 %vm578_vm2, %v1984_v36 }
  0x53   : > { %1857 = vmatprep.mubr.msk.bf16.mxu0 %vm578_vm2, %v1985_v37  ;;  %1909 = vmatprep.mubr.msk.bf16.mxu1 %vm578_vm2, %v1986_v38 }
  0x5a   : > { %1858 = vmatmul.mubr.msk.bf16.gmra.mrb[28].mxu0 %vm578_vm2, %v1987_v39  ;;  %1910 = vmatmul.mubr.msk.bf16.gmra.mrb[28].mxu1 %vm578_vm2, %v1988_v40 }
  0x5b   : > { %1861 = vmatprep.mubr.msk.bf16.mxu0 %vm578_vm2, %v1989_v41  ;;  %1913 = vmatprep.mubr.msk.bf16.mxu1 %vm578_vm2, %v1990_v42 }
  0x62   : > { %1862 = vmatmul.mubr.msk.bf16.gmra.mrb[32].mxu0 %vm578_vm2, %v1991_v43  ;;  %1914 = vmatmul.mubr.msk.bf16.gmra.mrb[32].mxu1 %vm578_vm2, %v1992_v44 }
  0x63   : > { %1865 = vmatprep.mubr.msk.bf16.mxu0 %vm578_vm2, %v1993_v45  ;;  %1917 = vmatprep.mubr.msk.bf16.mxu1 %vm578_vm2, %v1994_v46 }
  0x6a   : > { %1866 = vmatmul.mubr.msk.bf16.gmra.mrb[36].mxu0 %vm578_vm2, %v1995_v47  ;;  %1918 = vmatmul.mubr.msk.bf16.gmra.mrb[36].mxu1 %vm578_vm2, %v1996_v48 }
  0x6b   : > { %1869 = vmatprep.mubr.msk.bf16.mxu0 %vm578_vm2, %v1997_v49  ;;  %1921 = vmatprep.mubr.msk.bf16.mxu1 %vm578_vm2, %v1998_v50 }
  0x72   : > { %1870 = vmatmul.mubr.msk.bf16.gmra.mrb[40].mxu0 %vm578_vm2, %v1999_v51  ;;  %1922 = vmatmul.mubr.msk.bf16.gmra.mrb[40].mxu1 %vm578_vm2, %v2000_v52  ;;  %v2269_v51 = vld [vmem:[%s2372_s2] ss:$0 sm:$0xff] }
  0x73   : > { %1873 = vmatprep.mubr.msk.bf16.mxu0 %vm578_vm2, %v2001_v53  ;;  %1925 = vmatprep.mubr.msk.bf16.mxu1 %vm578_vm2, %v2002_v54 }
  0x7a   : > { %1874 = vmatmul.mubr.msk.bf16.gmra.mrb[44].mxu0 %vm578_vm2, %v2003_v55  ;;  %1926 = vmatmul.mubr.msk.bf16.gmra.mrb[44].mxu1 %vm578_vm2, %v2004_v56 }
  0x7b   : > { %1877 = vmatprep.mubr.msk.bf16.mxu0 %vm578_vm2, %v2005_v57  ;;  %1929 = vmatprep.mubr.msk.bf16.mxu1 %vm578_vm2, %v2006_v58 }
  0x82   : > { %1878 = vmatmul.mubr.msk.bf16.gmra.mrb[48].mxu0 %vm578_vm2, %v2007_v59  ;;  %1930 = vmatmul.mubr.msk.bf16.gmra.mrb[48].mxu1 %vm578_vm2, %v2008_v60 }
  0xf5   : > { %v2172_v61 = vpop.f32.mrb[0].mxu0  ;;  %v2174_v62 = vpop.f32.mrb[0].mxu1 }
  0xf6   : > { %v776_v63 = vpop.f32.mrb[1].mxu0  ;;  %v984_v0 = vpop.f32.mrb[1].mxu1 }
  0xf7   : > { %v2176_v1 = vpop.f32.mrb[2].mxu0  ;;  %v2178_v2 = vpop.f32.mrb[2].mxu1 }
  0xf8   : > { %v779_v3 = vpop.f32.mrb[3].mxu0  ;;  %v987_v4 = vpop.f32.mrb[3].mxu1 }
  0xfd   : > { %v2180_v5 = vpop.f32.mrb[4].mxu0  ;;  %v2182_v6 = vpop.f32.mrb[4].mxu1 }
  0xfe   : > { %v2184_v7 = vpop.f32.mrb[5].mxu0  ;;  %v2186_v8 = vpop.f32.mrb[5].mxu1 }
  0xff   : > { %v2188_v9 = vpop.f32.mrb[6].mxu0  ;;  %v2190_v10 = vpop.f32.mrb[6].mxu1 }
 0x100   : > { %v2192_v11 = vpop.f32.mrb[7].mxu0  ;;  %v2194_v12 = vpop.f32.mrb[7].mxu1 }
 0x105   : > { %v2196_v13 = vpop.f32.mrb[8].mxu0  ;;  %v2198_v14 = vpop.f32.mrb[8].mxu1 }
 0x106   : > { %v2200_v15 = vpop.f32.mrb[9].mxu0  ;;  %v2202_v16 = vpop.f32.mrb[9].mxu1 }
 0x107   : > { %v2204_v17 = vpop.f32.mrb[10].mxu0  ;;  %v2206_v18 = vpop.f32.mrb[10].mxu1 }
 0x108   : > { %v2208_v19 = vpop.f32.mrb[11].mxu0  ;;  %v2210_v20 = vpop.f32.mrb[11].mxu1 }
 0x10d   : > { %v2212_v21 = vpop.f32.mrb[12].mxu0  ;;  %v2214_v22 = vpop.f32.mrb[12].mxu1 }
 0x10e   : > { %v2216_v23 = vpop.f32.mrb[13].mxu0  ;;  %v2218_v24 = vpop.f32.mrb[13].mxu1 }
 0x10f   : > { %v2220_v25 = vpop.f32.mrb[14].mxu0  ;;  %v2222_v26 = vpop.f32.mrb[14].mxu1 }
 0x110   : > { %v2224_v27 = vpop.f32.mrb[15].mxu0  ;;  %v2226_v28 = vpop.f32.mrb[15].mxu1 }
 0x115   : > { %v2228_v29 = vpop.f32.mrb[16].mxu0  ;;  %v2230_v30 = vpop.f32.mrb[16].mxu1 }
 0x116   : > { %v2232_v31 = vpop.f32.mrb[17].mxu0  ;;  %v2234_v32 = vpop.f32.mrb[17].mxu1 }
 0x117   : > { %v2236_v33 = vpop.f32.mrb[18].mxu0  ;;  %v2238_v34 = vpop.f32.mrb[18].mxu1 }
 0x118   : > { %v2240_v35 = vpop.f32.mrb[19].mxu0  ;;  %v2242_v36 = vpop.f32.mrb[19].mxu1 }
 0x11d   : > { %v2244_v37 = vpop.f32.mrb[20].mxu0  ;;  %v2246_v38 = vpop.f32.mrb[20].mxu1 }
 0x11e   : > { %v2248_v39 = vpop.f32.mrb[21].mxu0  ;;  %v2250_v40 = vpop.f32.mrb[21].mxu1 }
 0x11f   : > { %v2252_v41 = vpop.f32.mrb[22].mxu0  ;;  %v2254_v42 = vpop.f32.mrb[22].mxu1 }
 0x120   : > { %2374 = vst [vmem:[#allocation2_spill] sm:$0xff] %v2252_v41  ;;  %2375 = vst [vmem:[#allocation3_spill] sm:$0xff] %v2254_v42  ;;  %v2256_v43 = vpop.f32.mrb[23].mxu0  ;;  %v2258_v44 = vpop.f32.mrb[23].mxu1 }
 0x125   : > { %v1855_v45 = vpop.f32.mrb[24].mxu0  ;;  %v1907_v46 = vpop.f32.mrb[24].mxu1 }
 0x126   : > { %v1191_v47 = vmax.f32 %v776_v63, %v1855_v45  ;;  %v1217_v48 = vmax.f32 %v984_v0, %v1907_v46  ;;  %v2262_v49 = vpop.f32.mrb[25].mxu0  ;;  %v2264_v50 = vpop.f32.mrb[25].mxu1 }
 0x127   : > { %v1856_v52 = vpop.f32.mrb[26].mxu0  ;;  %v1908_v53 = vpop.f32.mrb[26].mxu1 }
 0x128   : > { %v1243_v54 = vmax.f32 %v1191_v47, %v1217_v48  ;;  %v1192_v55 = vmax.f32 %v779_v3, %v1856_v52  ;;  %v1218_v56 = vmax.f32 %v987_v4, %v1908_v53  ;;  %v2271_v57 = vpop.f32.mrb[27].mxu0  ;;  %v2273_v58 = vpop.f32.mrb[27].mxu1 }
 0x12a   : > { %v1276_v59 = vadd.f32 %v2269_v51, %v1243_v54  ;;  %v1244_v60 = vmax.f32 %v1192_v55, %v1218_v56 }
 0x12c   : > { %v1277_v63 = vadd.f32 %v2269_v51, %v1244_v60  ;;  %v1302_v46 = vmax.f32 %v1276_v59, 0.0 }
 0x12d   : > { %v1859_v0 = vpop.f32.mrb[28].mxu0  ;;  %v1911_v45 = vpop.f32.mrb[28].mxu1 }
 0x12e   : > { %v1303_v42 = vmax.f32 %v1277_v63, 0.0  ;;  %v1195_v41 = vmax.f32 %v2184_v7, %v1859_v0  ;;  %v1221_v3 = vmax.f32 %v2186_v8, %v1911_v45  ;;  %v888_v47 = vpop.f32.mrb[29].mxu0  ;;  %v1096_v4 = vpop.f32.mrb[29].mxu1 }
 0x12f   : > { %v1193_v48 = vmax.f32 %v2172_v61, %v888_v47  ;;  %v1219_v52 = vmax.f32 %v2174_v62, %v1096_v4  ;;  %v1860_v53 = vpop.f32.mrb[30].mxu0  ;;  %v1912_v54 = vpop.f32.mrb[30].mxu1 }
 0x130   : > { %v1688_v55 = vpack.c.bf16 %v1303_v42, %v1302_v46  ;;  %v1247_v56 = vmax.f32 %v1195_v41, %v1221_v3  ;;  %v1196_v7 = vmax.f32 %v2192_v11, %v1860_v53  ;;  %v1222_v8 = vmax.f32 %v2194_v12, %v1912_v54  ;;  %v891_v59 = vpop.f32.mrb[31].mxu0  ;;  %v1099_v60 = vpop.f32.mrb[31].mxu1 }
 0x131   : > { %v1245_v63 = vmax.f32 %v1193_v48, %v1219_v52  ;;  %v1194_v0 = vmax.f32 %v2176_v1, %v891_v59  ;;  %v1220_v45 = vmax.f32 %v2178_v2, %v1099_v60 }
 0x132   : > { %1689 = vst [vmem:[%s2282_s8] sm:$0xff] %v1688_v55   ;;  %v1280_v61 = vadd.f32 %v2269_v51, %v1247_v56  ;;  %v1248_v47 = vmax.f32 %v1196_v7, %v1222_v8 }
 0x133   : > { %v1278_v62 = vadd.f32 %v2269_v51, %v1245_v63  ;;  %v1246_v4 = vmax.f32 %v1194_v0, %v1220_v45 }
 0x134   : > { %v1281_v41 = vadd.f32 %v2269_v51, %v1248_v47  ;;  %v1306_v46 = vmax.f32 %v1280_v61, 0.0 }
 0x135   : > { %v1279_v11 = vadd.f32 %v2269_v51, %v1246_v4  ;;  %v1863_v42 = vpop.f32.mrb[32].mxu0  ;;  %v1915_v12 = vpop.f32.mrb[32].mxu1  ;;  %v1304_v53 = vmax.f32 %v1278_v62, 0.0 }
 0x136   : > { %v1307_v3 = vmax.f32 %v1281_v41, 0.0  ;;  %v1199_v48 = vmax.f32 %v2200_v15, %v1863_v42  ;;  %v1225_v1 = vmax.f32 %v2202_v16, %v1915_v12  ;;  %v904_v2 = vpop.f32.mrb[33].mxu0  ;;  %v1112_v52 = vpop.f32.mrb[33].mxu1 }
 0x137   : > { %v1305_v54 = vmax.f32 %v1279_v11, 0.0  ;;  %v1197_v55 = vmax.f32 %v2180_v5, %v904_v2  ;;  %v1223_v56 = vmax.f32 %v2182_v6, %v1112_v52  ;;  %v1864_v7 = vpop.f32.mrb[34].mxu0  ;;  %v1916_v8 = vpop.f32.mrb[34].mxu1 }
 0x138   : > { %v1698_v59 = vpack.c.bf16 %v1307_v3, %v1306_v46  ;;  %v1251_v60 = vmax.f32 %v1199_v48, %v1225_v1  ;;  %v1200_v63 = vmax.f32 %v2208_v19, %v1864_v7  ;;  %v1226_v15 = vmax.f32 %v2210_v20, %v1916_v8  ;;  %v907_v0 = vpop.f32.mrb[35].mxu0  ;;  %v1115_v16 = vpop.f32.mrb[35].mxu1 }
 0x139   : > { %v1693_v45 = vpack.c.bf16 %v1305_v54, %v1304_v53  ;;  %v1249_v61 = vmax.f32 %v1197_v55, %v1223_v56  ;;  %v1198_v47 = vmax.f32 %v2188_v9, %v907_v0  ;;  %v1224_v62 = vmax.f32 %v2190_v10, %v1115_v16 }
 0x13a   : > { %1751 = vst [vmem:[%s2282_s8 + $0x10] sm:$0xff] %v1698_v59   ;;  %v1284_v5 = vadd.f32 %v2269_v51, %v1251_v60  ;;  %v1252_v6 = vmax.f32 %v1200_v63, %v1226_v15 }
 0x13b   : > { %1750 = vst [vmem:[%s2282_s8 + $0x8] sm:$0xff] %v1693_v45   ;;  %v1282_v4 = vadd.f32 %v2269_v51, %v1249_v61  ;;  %v1250_v41 = vmax.f32 %v1198_v47, %v1224_v62 }
 0x13c   : > { %v1285_v19 = vadd.f32 %v2269_v51, %v1252_v6  ;;  %v1310_v12 = vmax.f32 %v1284_v5, 0.0 }
 0x13d   : > { %v1283_v20 = vadd.f32 %v2269_v51, %v1250_v41  ;;  %v1867_v11 = vpop.f32.mrb[36].mxu0  ;;  %v1919_v42 = vpop.f32.mrb[36].mxu1  ;;  %v1308_v1 = vmax.f32 %v1282_v4, 0.0 }
 0x13e   : > { %v1311_v46 = vmax.f32 %v1285_v19, 0.0  ;;  %v1203_v9 = vmax.f32 %v2216_v23, %v1867_v11  ;;  %v1229_v10 = vmax.f32 %v2218_v24, %v1919_v42  ;;  %v920_v3 = vpop.f32.mrb[37].mxu0  ;;  %v1128_v48 = vpop.f32.mrb[37].mxu1 }
 0x13f   : > { %v1309_v2 = vmax.f32 %v1283_v20, 0.0  ;;  %v1201_v52 = vmax.f32 %v2196_v13, %v920_v3  ;;  %v1227_v53 = vmax.f32 %v2198_v14, %v1128_v48  ;;  %v1868_v54 = vpop.f32.mrb[38].mxu0  ;;  %v1920_v55 = vpop.f32.mrb[38].mxu1 }
 0x140   : > { %v1708_v56 = vpack.c.bf16 %v1311_v46, %v1310_v12  ;;  %v1255_v7 = vmax.f32 %v1203_v9, %v1229_v10  ;;  %v1204_v8 = vmax.f32 %v2224_v27, %v1868_v54  ;;  %v1230_v23 = vmax.f32 %v2226_v28, %v1920_v55  ;;  %v923_v59 = vpop.f32.mrb[39].mxu0  ;;  %v1131_v24 = vpop.f32.mrb[39].mxu1 }
 0x141   : > { %v1703_v60 = vpack.c.bf16 %v1309_v2, %v1308_v1  ;;  %v1253_v63 = vmax.f32 %v1201_v52, %v1227_v53  ;;  %v1202_v15 = vmax.f32 %v2204_v17, %v923_v59  ;;  %v1228_v0 = vmax.f32 %v2206_v18, %v1131_v24 }
 0x142   : > { %1753 = vst [vmem:[%s2282_s8 + $0x20] sm:$0xff] %v1708_v56   ;;  %v1288_v13 = vadd.f32 %v2269_v51, %v1255_v7  ;;  %v1256_v14 = vmax.f32 %v1204_v8, %v1230_v23 }
 0x143   : > { %1752 = vst [vmem:[%s2282_s8 + $0x18] sm:$0xff] %v1703_v60   ;;  %v1286_v16 = vadd.f32 %v2269_v51, %v1253_v63  ;;  %v1254_v45 = vmax.f32 %v1202_v15, %v1228_v0 }
 0x144   : > { %v1289_v27 = vadd.f32 %v2269_v51, %v1256_v14  ;;  %v1314_v62 = vmax.f32 %v1288_v13, 0.0 }
 0x145   : > { %v1287_v28 = vadd.f32 %v2269_v51, %v1254_v45  ;;  %v1871_v61 = vpop.f32.mrb[40].mxu0  ;;  %v1923_v47 = vpop.f32.mrb[40].mxu1  ;;  %v1312_v41 = vmax.f32 %v1286_v16, 0.0 }
 0x146   : > { %v1315_v5 = vmax.f32 %v1289_v27, 0.0  ;;  %v1207_v17 = vmax.f32 %v2232_v31, %v1871_v61  ;;  %v1233_v18 = vmax.f32 %v2234_v32, %v1923_v47  ;;  %v936_v6 = vpop.f32.mrb[41].mxu0  ;;  %v1144_v4 = vpop.f32.mrb[41].mxu1 }
 0x147   : > { %v1313_v19 = vmax.f32 %v1287_v28, 0.0  ;;  %v1205_v20 = vmax.f32 %v2212_v21, %v936_v6  ;;  %v1231_v11 = vmax.f32 %v2214_v22, %v1144_v4  ;;  %v1872_v42 = vpop.f32.mrb[42].mxu0  ;;  %v1924_v12 = vpop.f32.mrb[42].mxu1 }
 0x148   : > { %v1718_v46 = vpack.c.bf16 %v1315_v5, %v1314_v62  ;;  %v1259_v9 = vmax.f32 %v1207_v17, %v1233_v18  ;;  %v1208_v10 = vmax.f32 %v2240_v35, %v1872_v42  ;;  %v1234_v31 = vmax.f32 %v2242_v36, %v1924_v12  ;;  %v939_v3 = vpop.f32.mrb[43].mxu0  ;;  %v1147_v32 = vpop.f32.mrb[43].mxu1 }
 0x149   : > { %v1713_v48 = vpack.c.bf16 %v1313_v19, %v1312_v41  ;;  %v1257_v1 = vmax.f32 %v1205_v20, %v1231_v11  ;;  %v1206_v2 = vmax.f32 %v2220_v25, %v939_v3  ;;  %v1232_v52 = vmax.f32 %v2222_v26, %v1147_v32 }
 0x14a   : > { %1755 = vst [vmem:[%s2282_s8 + $0x30] sm:$0xff] %v1718_v46   ;;  %v1292_v21 = vadd.f32 %v2269_v51, %v1259_v9  ;;  %v1260_v22 = vmax.f32 %v1208_v10, %v1234_v31 }
 0x14b   : > { %1754 = vst [vmem:[%s2282_s8 + $0x28] sm:$0xff] %v1713_v48   ;;  %v1290_v53 = vadd.f32 %v2269_v51, %v1257_v1  ;;  %v1258_v54 = vmax.f32 %v1206_v2, %v1232_v52  ;;  %v2376_v52 = vld [vmem:[#allocation2_spill] sm:$0xff] }
 0x14c   : > { %v1293_v35 = vadd.f32 %v2269_v51, %v1260_v22  ;;  %v1318_v7 = vmax.f32 %v1292_v21, 0.0  ;;  %v2377_v22 = vld [vmem:[#allocation3_spill] sm:$0xff] }
 0x14d   : > { %v1291_v36 = vadd.f32 %v2269_v51, %v1258_v54  ;;  %v1875_v55 = vpop.f32.mrb[44].mxu0  ;;  %v1927_v56 = vpop.f32.mrb[44].mxu1  ;;  %v1316_v24 = vmax.f32 %v1290_v53, 0.0 }
 0x14e   : > { %v1319_v8 = vmax.f32 %v1293_v35, 0.0  ;;  %v1211_v25 = vmax.f32 %v2248_v39, %v1875_v55  ;;  %v1237_v26 = vmax.f32 %v2250_v40, %v1927_v56  ;;  %v952_v23 = vpop.f32.mrb[45].mxu0  ;;  %v1160_v59 = vpop.f32.mrb[45].mxu1 }
 0x14f   : > { %v1317_v60 = vmax.f32 %v1291_v36, 0.0  ;;  %v1209_v63 = vmax.f32 %v2228_v29, %v952_v23  ;;  %v1235_v15 = vmax.f32 %v2230_v30, %v1160_v59  ;;  %v1876_v0 = vpop.f32.mrb[46].mxu0  ;;  %v1928_v13 = vpop.f32.mrb[46].mxu1 }
 0x150   : > { %v1728_v14 = vpack.c.bf16 %v1319_v8, %v1318_v7  ;;  %v1263_v16 = vmax.f32 %v1211_v25, %v1237_v26  ;;  %v1212_v45 = vmax.f32 %v2256_v43, %v1876_v0  ;;  %v1238_v39 = vmax.f32 %v2258_v44, %v1928_v13  ;;  %v955_v27 = vpop.f32.mrb[47].mxu0  ;;  %v1163_v40 = vpop.f32.mrb[47].mxu1 }
 0x151   : > { %v1723_v28 = vpack.c.bf16 %v1317_v60, %v1316_v24  ;;  %v1261_v61 = vmax.f32 %v1209_v63, %v1235_v15  ;;  %v1210_v47 = vmax.f32 %v2236_v33, %v955_v27  ;;  %v1236_v62 = vmax.f32 %v2238_v34, %v1163_v40 }
 0x152   : > { %1757 = vst [vmem:[%s2282_s8 + $0x40] sm:$0xff] %v1728_v14   ;;  %v1296_v29 = vadd.f32 %v2269_v51, %v1263_v16  ;;  %v1264_v30 = vmax.f32 %v1212_v45, %v1238_v39 }
 0x153   : > { %1756 = vst [vmem:[%s2282_s8 + $0x38] sm:$0xff] %v1723_v28   ;;  %v1294_v5 = vadd.f32 %v2269_v51, %v1261_v61  ;;  %v1262_v17 = vmax.f32 %v1210_v47, %v1236_v62 }
 0x154   : > { %v1297_v43 = vadd.f32 %v2269_v51, %v1264_v30  ;;  %v1322_v4 = vmax.f32 %v1296_v29, 0.0 }
 0x155   : > { %v1295_v44 = vadd.f32 %v2269_v51, %v1262_v17  ;;  %v1879_v18 = vpop.f32.mrb[48].mxu0  ;;  %v1931_v6 = vpop.f32.mrb[48].mxu1  ;;  %v1320_v11 = vmax.f32 %v1294_v5, 0.0 }
 0x156   : > { %v1323_v41 = vmax.f32 %v1297_v43, 0.0  ;;  %v1215_v33 = vmax.f32 %v2262_v49, %v1879_v18  ;;  %v1241_v34 = vmax.f32 %v2264_v50, %v1931_v6  ;;  %v968_v19 = vpop.f32.mrb[49].mxu0  ;;  %v1176_v20 = vpop.f32.mrb[49].mxu1 }
 0x157   : > { %v1321_v42 = vmax.f32 %v1295_v44, 0.0  ;;  %v1213_v12 = vmax.f32 %v2244_v37, %v968_v19  ;;  %v1239_v46 = vmax.f32 %v2246_v38, %v1176_v20  ;;  %v1880_v9 = vpop.f32.mrb[50].mxu0  ;;  %v1932_v10 = vpop.f32.mrb[50].mxu1 }
 0x158   : > { %v1738_v31 = vpack.c.bf16 %v1323_v41, %v1322_v4  ;;  %v1267_v3 = vmax.f32 %v1215_v33, %v1241_v34  ;;  %v1216_v32 = vmax.f32 %v2271_v57, %v1880_v9  ;;  %v1242_v49 = vmax.f32 %v2273_v58, %v1932_v10  ;;  %v971_v48 = vpop.f32.mrb[51].mxu0  ;;  %v1179_v50 = vpop.f32.mrb[51].mxu1 }
 0x159   : > { %v1733_v1 = vpack.c.bf16 %v1321_v42, %v1320_v11  ;;  %v1265_v2 = vmax.f32 %v1213_v12, %v1239_v46  ;;  %v1214_v21 = vmax.f32 %v2376_v52, %v971_v48  ;;  %v1240_v37 = vmax.f32 %v2377_v22, %v1179_v50 }
 0x15a   : > { %1759 = vst [vmem:[%s2282_s8 + $0x50] sm:$0xff] %v1738_v31   ;;  %v1300_v38 = vadd.f32 %v2269_v51, %v1267_v3  ;;  %v1268_v53 = vmax.f32 %v1216_v32, %v1242_v49 }
 0x15b   : > { %1758 = vst [vmem:[%s2282_s8 + $0x48] sm:$0xff] %v1733_v1   ;;  %v1298_v54 = vadd.f32 %v2269_v51, %v1265_v2  ;;  %v1266_v57 = vmax.f32 %v1214_v21, %v1240_v37 }
 0x15c   : > { %v1301_v58 = vadd.f32 %v2269_v51, %v1268_v53  ;;  %v1326_v36 = vmax.f32 %v1300_v38, 0.0 }
 0x15d   : > { %v1299_v35 = vadd.f32 %v2269_v51, %v1266_v57  ;;  %v1324_v56 = vmax.f32 %v1298_v54, 0.0 }
 0x15e   : > { %v1327_v55 = vmax.f32 %v1301_v58, 0.0 }
 0x15f   : > { %v1325_v7 = vmax.f32 %v1299_v35, 0.0 }
 0x160   : > { %v1748_v8 = vpack.c.bf16 %v1327_v55, %v1326_v36 }
 0x161   : > { %v1743_v25 = vpack.c.bf16 %v1325_v7, %v1324_v56 }
 0x162   : > { %1761 = vst [vmem:[%s2282_s8 + $0x60] sm:$0xff] %v1748_v8  }
 0x163   : > { %1760 = vst [vmem:[%s2282_s8 + $0x58] sm:$0xff] %v1743_v25  }
 0x164 PF: > { %s13_s12 = sadd.s32 1, %s2015_s12  }
 0x165   : > { %p10_p5 = scmp.ge.s32.totalorder %s13_s12, 4  }
 0x167   :  { %12 = sbr.rel (!%p10_p5) target bundleno = 1 (0x1), region = 62 }

// kernel: net_forward.4
= control target key start
LH: loop header
LB: loop body
LE: loop exit
PB: predicated region body
PF: predicated region fallthrough
CT: control target
= control target key end

     0   :  { %s695_s12 = smov 0   ;;  %s775_s0 = inlined_call_operand.vmem [shape: bf16[256,150], index: 0, kind: input, shape index: {}]   ;;  %s776_s1 = inlined_call_operand.vmem [shape: bf16[150,128], index: 1, kind: input, shape index: {}]   ;;  %s777_s2 = inlined_call_operand.vmem [shape: f32[1,128], index: 2, kind: input, shape index: {}]   ;;  %s778_s3 = inlined_call_operand.vmem [shape: f32[64,128], index: 3, kind: output, shape index: {}]  }
   0x1 LB: > { %s555_s13 = sadd.s32 4294967295, %s672_s12   ;;  %p559_p0 = scmp.ge.s32.totalorder %s672_s12, 1  ;;  %s672_s12 = sphi %s695_s12, %s13_s12  }
   0x2   : > { %p139_p1 = scmp.lt.s32.totalorder %s672_s12, 3 }
   0x4   : > { %p140_p2 = pnand %p559_p0, %p139_p1 }
   0x5   : > { %v632_v0 = vld [vmem:[%s776_s1] sm:$0xff] (!%p140_p2)   ;;  %v674_v1 = vmov (!%p140_p2), 0   ;;  %v633_v2 = vld [vmem:[%s776_s1 + $0x8] sm:$0xff] (!%p140_p2)   ;;  %s560_s18 = sshll.u32 (!%p140_p2), %s555_s13, 4  ;;  %v634_v3 = vld [vmem:[%s776_s1 + $0x10] sm:$0xff] (!%p140_p2)   ;;  %vm342_vm0 = vcmask (!%p140_p2), 179200  }
   0x6   : > { %143 = sbr.rel (%p140_p2) target bundleno = 293 (0x125), region = 32  ;;  %371 = vmatprep.subr.bf16.mxu0 (!%p140_p2), %v674_v1  ;;  %603 = vmatprep.subr.bf16.mxu1 (!%p140_p2), %v674_v1  ;;  %p165_p3 = scmp.lt.s32.totalorder (!%p140_p2), %s560_s18, 31  ;;  %v635_v4 = vld [vmem:[%s776_s1 + $0x18] sm:$0xff] (!%p140_p2)   ;;  %v636_v7 = vld [vmem:[%s776_s1 + $0x20] sm:$0xff] (!%p140_p2)   ;;  %v637_v8 = vld [vmem:[%s776_s1 + $0x28] sm:$0xff] (!%p140_p2)   ;;  %vm367_vm1 = vcmask (!%p140_p2), 1042432  }
   0x7   : > { %372 = vmatpush1.bf16.msra.mxu0 (!%p140_p2), %v632_v0  ;;  %613 = vmatpush1.bf16.msra.mxu1 (!%p140_p2), %v632_v0  ;;  %v638_v9 = vld [vmem:[%s776_s1 + $0x30] sm:$0xff] (!%p140_p2)   ;;  %v639_v10 = vld [vmem:[%s776_s1 + $0x38] sm:$0xff] (!%p140_p2)   ;;  %v640_v11 = vld [vmem:[%s776_s1 + $0x40] sm:$0xff] (!%p140_p2)   ;;  %s563_s14 = sshll.u32 (!%p140_p2), %s555_s13, 2 }
   0x8   : > { %373 = vmatprep.subr.bf16.mxu0 (!%p140_p2), %v674_v1  ;;  %604 = vmatprep.subr.bf16.mxu1 (!%p140_p2), %v674_v1  ;;  %v641_v12 = vld [vmem:[%s776_s1 + $0x48] ss:$0 sps:$4 sm:$0x77] (!%p140_p2)   ;;  %p172_p4 = scmp.lt.s32.totalorder (!%p140_p2), %s563_s14, 7  ;;  %v599_v50 = vld [vmem:[%s777_s2] ss:$0 sm:$0xff] (!%p140_p2) }
   0x9   : > { %v369_v13 = vsel (!%p140_p2), %vm367_vm1, %v641_v12, 0 }
   0xb   : > { %374 = vmatpush1.bf16.msra.mxu0 (!%p140_p2), %v633_v2  ;;  %614 = vmatpush1.bf16.msra.mxu1 (!%p140_p2), %v633_v2 }
   0xc   : > { %375 = vmatprep.subr.bf16.mxu0 (!%p140_p2), %v674_v1  ;;  %605 = vmatprep.subr.bf16.mxu1 (!%p140_p2), %v674_v1 }
   0xd   : > { %s780_s18 = smov (!%p165_p3, %s560_s18), 31  ;;  %s782_s14 = smov (!%p172_p4, %s563_s14), 7 }
   0xe   : > { %s602_s21 = sshll.u32 %s780_s18, 3  ;;  %s564_s13 = sshll.u32 %s782_s14, 3 }
   0xf   : > { %s717_s24 = scalar_lea.vmem %s775_s0, %s602_s21  ;;  %376 = vmatpush1.bf16.msra.mxu0 %v634_v3  ;;  %615 = vmatpush1.bf16.msra.mxu1 %v634_v3  ;;  %s175_s19 = scalar_lea.vmem %s778_s3, %s564_s13 }
  0x10   : > { %v644_v5 = vld [vmem:[%s717_s24 + $0x4] ss:$8 sps:$4 sm:$0xff]   ;;  %377 = vmatprep.subr.bf16.mxu0 %v674_v1  ;;  %606 = vmatprep.subr.bf16.mxu1 %v674_v1  ;;  %v642_v14 = vld [vmem:[%s717_s24] ss:$8 sps:$4 sm:$0xff]   ;;  %v648_v16 = vld [vmem:[%s717_s24 + $0x14] ss:$8 sps:$4 sm:$0xff]  }
  0x11   : > { %591 = vmatprep.mubr.msk.bf16.mxu0 %vm342_vm0, %v644_v5  ;;  %v647_v6 = vld [vmem:[%s717_s24 + $0x44] ss:$8 sps:$4 sm:$0xff]   ;;  %v645_v15 = vld [vmem:[%s717_s24 + $0x40] ss:$8 sps:$4 sm:$0xff]   ;;  %v650_v17 = vld [vmem:[%s717_s24 + $0x54] ss:$8 sps:$4 sm:$0xff]  }
  0x12   : > { %595 = vmatprep.mubr.msk.bf16.mxu1 %vm342_vm0, %v647_v6  ;;  %v652_v18 = vld [vmem:[%s717_s24 + $0x10] ss:$8 sps:$4 sm:$0xff]   ;;  %v654_v20 = vld [vmem:[%s717_s24 + $0x24] ss:$8 sps:$4 sm:$0xff]   ;;  %v658_v22 = vld [vmem:[%s717_s24 + $0x20] ss:$8 sps:$4 sm:$0xff]  }
  0x13   : > { %378 = vmatpush1.bf16.msra.mxu0 %v635_v4  ;;  %616 = vmatpush1.bf16.msra.mxu1 %v635_v4  ;;  %v653_v19 = vld [vmem:[%s717_s24 + $0x50] ss:$8 sps:$4 sm:$0xff]   ;;  %v656_v21 = vld [vmem:[%s717_s24 + $0x64] ss:$8 sps:$4 sm:$0xff]   ;;  %v659_v23 = vld [vmem:[%s717_s24 + $0x60] ss:$8 sps:$4 sm:$0xff]  }
  0x14   : > { %379 = vmatprep.subr.bf16.mxu0 %v674_v1  ;;  %607 = vmatprep.subr.bf16.mxu1 %v674_v1  ;;  %v660_v24 = vld [vmem:[%s717_s24 + $0x34] ss:$8 sps:$4 sm:$0xff]   ;;  %v664_v26 = vld [vmem:[%s717_s24 + $0x30] ss:$8 sps:$4 sm:$0xff]  }
  0x15   : > { %v662_v25 = vld [vmem:[%s717_s24 + $0x74] ss:$8 sps:$4 sm:$0xff]   ;;  %v665_v27 = vld [vmem:[%s717_s24 + $0x70] ss:$8 sps:$4 sm:$0xff]  }
  0x17   : > { %380 = vmatpush1.bf16.msra.mxu0 %v636_v7  ;;  %617 = vmatpush1.bf16.msra.mxu1 %v636_v7 }
  0x18   : > { %381 = vmatprep.subr.bf16.mxu0 %v674_v1  ;;  %608 = vmatprep.subr.bf16.mxu1 %v674_v1 }
  0x1b   : > { %382 = vmatpush1.bf16.msra.mxu0 %v637_v8  ;;  %618 = vmatpush1.bf16.msra.mxu1 %v637_v8 }
  0x1c   : > { %383 = vmatprep.subr.bf16.mxu0 %v674_v1  ;;  %609 = vmatprep.subr.bf16.mxu1 %v674_v1 }
  0x1f   : > { %384 = vmatpush1.bf16.msra.mxu0 %v638_v9  ;;  %619 = vmatpush1.bf16.msra.mxu1 %v638_v9 }
  0x20   : > { %385 = vmatprep.subr.bf16.mxu0 %v674_v1  ;;  %610 = vmatprep.subr.bf16.mxu1 %v674_v1 }
  0x23   : > { %386 = vmatpush1.bf16.msra.mxu0 %v639_v10  ;;  %620 = vmatpush1.bf16.msra.mxu1 %v639_v10 }
  0x24   : > { %387 = vmatprep.subr.bf16.mxu0 %v674_v1  ;;  %611 = vmatprep.subr.bf16.mxu1 %v674_v1 }
  0x27   : > { %388 = vmatpush1.bf16.msra.mxu0 %v640_v11  ;;  %621 = vmatpush1.bf16.msra.mxu1 %v640_v11 }
  0x28   : > { %389 = vmatprep.subr.bf16.mxu0 %v674_v1  ;;  %612 = vmatprep.subr.bf16.mxu1 %v674_v1 }
  0x2b   : > { %390 = vmatpush1.bf16.msra.mxu0 %v369_v13  ;;  %622 = vmatpush1.bf16.msra.mxu1 %v369_v13 }
  0x2e   : > { %404 = vmatmul.mubr.bf16.vlgmr.msra.gmra.mrb[0].mxu0 %v642_v14  ;;  %436 = vmatmul.mubr.bf16.vlgmr.msra.gmra.mrb[0].mxu1 %v645_v15 }
  0x2f   : > { %592 = vmatprep.mubr.msk.bf16.mxu0 %vm342_vm0, %v648_v16  ;;  %596 = vmatprep.mubr.msk.bf16.mxu1 %vm342_vm0, %v650_v17 }
  0x36   : > { %412 = vmatmul.mubr.bf16.gmra.mrb[4].mxu0 %v652_v18  ;;  %444 = vmatmul.mubr.bf16.gmra.mrb[4].mxu1 %v653_v19 }
  0x37   : > { %593 = vmatprep.mubr.msk.bf16.mxu0 %vm342_vm0, %v654_v20  ;;  %597 = vmatprep.mubr.msk.bf16.mxu1 %vm342_vm0, %v656_v21 }
  0x3e   : > { %420 = vmatmul.mubr.bf16.gmra.mrb[8].mxu0 %v658_v22  ;;  %452 = vmatmul.mubr.bf16.gmra.mrb[8].mxu1 %v659_v23 }
  0x3f   : > { %594 = vmatprep.mubr.msk.bf16.mxu0 %vm342_vm0, %v660_v24  ;;  %598 = vmatprep.mubr.msk.bf16.mxu1 %vm342_vm0, %v662_v25 }
  0x46   : > { %428 = vmatmul.mubr.bf16.gmra.mrb[12].mxu0 %v664_v26  ;;  %460 = vmatmul.mubr.bf16.gmra.mrb[12].mxu1 %v665_v27 }
 0x101   : > { %v405_v28 = vpop.f32.mrb[0].mxu0  ;;  %v437_v29 = vpop.f32.mrb[0].mxu1 }
 0x102   : > { %v407_v30 = vpop.f32.mrb[1].mxu0  ;;  %v439_v31 = vpop.f32.mrb[1].mxu1 }
 0x103   : > { %v408_v32 = vpop.f32.mrb[2].mxu0  ;;  %v440_v33 = vpop.f32.mrb[2].mxu1 }
 0x104   : > { %v410_v34 = vpop.f32.mrb[3].mxu0  ;;  %v442_v35 = vpop.f32.mrb[3].mxu1 }
 0x109   : > { %v413_v36 = vpop.f32.mrb[4].mxu0  ;;  %v445_v37 = vpop.f32.mrb[4].mxu1 }
 0x10a   : > { %v415_v38 = vpop.f32.mrb[5].mxu0  ;;  %v447_v39 = vpop.f32.mrb[5].mxu1 }
 0x10b   : > { %v416_v40 = vpop.f32.mrb[6].mxu0  ;;  %v448_v41 = vpop.f32.mrb[6].mxu1 }
 0x10c   : > { %v418_v42 = vpop.f32.mrb[7].mxu0  ;;  %v450_v43 = vpop.f32.mrb[7].mxu1 }
 0x111   : > { %v421_v44 = vpop.f32.mrb[8].mxu0  ;;  %v453_v45 = vpop.f32.mrb[8].mxu1 }
 0x112   : > { %v468_v46 = vmax.f32 %v405_v28, %v421_v44  ;;  %v472_v47 = vmax.f32 %v437_v29, %v453_v45  ;;  %v423_v48 = vpop.f32.mrb[9].mxu0  ;;  %v455_v49 = vpop.f32.mrb[9].mxu1 }
 0x113   : > { %v424_v51 = vpop.f32.mrb[10].mxu0  ;;  %v456_v52 = vpop.f32.mrb[10].mxu1 }
 0x114   : > { %v476_v53 = vmax.f32 %v468_v46, %v472_v47  ;;  %v469_v54 = vmax.f32 %v408_v32, %v424_v51  ;;  %v473_v55 = vmax.f32 %v440_v33, %v456_v52  ;;  %v426_v56 = vpop.f32.mrb[11].mxu0  ;;  %v458_v57 = vpop.f32.mrb[11].mxu1 }
 0x116   : > { %v487_v58 = vadd.f32 %v599_v50, %v476_v53  ;;  %v477_v59 = vmax.f32 %v469_v54, %v473_v55 }
 0x118   : > { %v491_v60 = vmax.f32 %v487_v58, 0.0  ;;  %v488_v61 = vadd.f32 %v599_v50, %v477_v59 }
 0x119   : > { %v429_v62 = vpop.f32.mrb[12].mxu0  ;;  %v461_v63 = vpop.f32.mrb[12].mxu1 }
 0x11a   : > { %495 = vst [vmem:[%s175_s19] sm:$0xff] %v491_v60  ;;  %v492_v0 = vmax.f32 %v488_v61, 0.0  ;;  %v470_v1 = vmax.f32 %v413_v36, %v429_v62  ;;  %v474_v2 = vmax.f32 %v445_v37, %v461_v63  ;;  %v431_v3 = vpop.f32.mrb[13].mxu0  ;;  %v463_v4 = vpop.f32.mrb[13].mxu1 }
 0x11b   : > { %v432_v5 = vpop.f32.mrb[14].mxu0  ;;  %v464_v6 = vpop.f32.mrb[14].mxu1 }
 0x11c   : > { %496 = vst [vmem:[%s175_s19 + $0x8] sm:$0xff] %v492_v0  ;;  %v478_v7 = vmax.f32 %v470_v1, %v474_v2  ;;  %v471_v8 = vmax.f32 %v416_v40, %v432_v5  ;;  %v475_v9 = vmax.f32 %v448_v41, %v464_v6  ;;  %v434_v10 = vpop.f32.mrb[15].mxu0  ;;  %v466_v11 = vpop.f32.mrb[15].mxu1 }
 0x11e   : > { %v489_v12 = vadd.f32 %v599_v50, %v478_v7  ;;  %v479_v13 = vmax.f32 %v471_v8, %v475_v9 }
 0x120   : > { %v493_v14 = vmax.f32 %v489_v12, 0.0  ;;  %v490_v15 = vadd.f32 %v599_v50, %v479_v13 }
 0x122   : > { %497 = vst [vmem:[%s175_s19 + $0x10] sm:$0xff] %v493_v14  ;;  %v494_v16 = vmax.f32 %v490_v15, 0.0 }
 0x124   : > { %498 = vst [vmem:[%s175_s19 + $0x18] sm:$0xff] %v494_v16 }
 0x125 PF: > { %s13_s12 = sadd.s32 1, %s672_s12  }
 0x126   : > { %p10_p5 = scmp.ge.s32.totalorder %s13_s12, 4  }
 0x128   :  { %12 = sbr.rel (!%p10_p5) target bundleno = 1 (0x1), region = 62 }

// kernel: net_forward.5
= control target key start
LH: loop header
LB: loop body
LE: loop exit
PB: predicated region body
PF: predicated region fallthrough
CT: control target
= control target key end

     0   :  { %v727_v2 = vmov 0.0|0.0   ;;  %vm91_vm0 = vcmask 130048   ;;  %s1064_s1 = inlined_call_operand.vmem [shape: f32[400,128], index: 1, kind: input, shape index: {}]   ;;  %s1065_s0 = inlined_call_operand.vmem [shape: f32[16,400], index: 0, kind: input, shape index: {}]   ;;  %s1066_s3 = inlined_call_operand.vmem [shape: f32[128,128], index: 3, kind: input, shape index: {}]   ;;  %s1067_s5 = inlined_call_operand.vmem [shape: f32[128,128], index: 5, kind: input, shape index: {}]   ;;  %s1068_s2 = inlined_call_operand.vmem [shape: f32[1,128], index: 2, kind: input, shape index: {}]   ;;  %s1069_s4 = inlined_call_operand.vmem [shape: f32[1,128], index: 4, kind: input, shape index: {}]   ;;  %s1070_s6 = inlined_call_operand.vmem [shape: f32[1,128], index: 6, kind: input, shape index: {}]   ;;  %s1071_s7 = inlined_call_operand.vmem [shape: f32[16,128], index: 7, kind: output, shape index: {}]  }
   0x1   :  { %v50_v0 = vld [vmem:[%s1064_s1 + $0x80] sm:$0xff]  ;;  %v51_v1 = vld [vmem:[%s1064_s1 + $0x88] sm:$0xff]  ;;  %635 = vmatprep.subr.bf16.mxu1 %v727_v2  ;;  %v52_v10 = vld [vmem:[%s1064_s1 + $0x90] sm:$0xff] }
   0x2   :  { %v34_v3 = vld [vmem:[%s1064_s1] sm:$0xff]  ;;  %v603_v4 = vpack.c.bf16 %v51_v1, %v50_v0  ;;  %v35_v5 = vld [vmem:[%s1064_s1 + $0x8] sm:$0xff]  ;;  %v53_v11 = vld [vmem:[%s1064_s1 + $0x98] sm:$0xff] }
   0x3   :  { %v66_v6 = vld [vmem:[%s1064_s1 + $0x100] sm:$0xff]  ;;  %v67_v7 = vld [vmem:[%s1064_s1 + $0x108] sm:$0xff]  ;;  %v605_v8 = vpack.c.bf16 %v35_v5, %v34_v3  ;;  %v36_v12 = vld [vmem:[%s1064_s1 + $0x10] sm:$0xff]  ;;  %v607_v13 = vpack.c.bf16 %v53_v11, %v52_v10 }
   0x4   :  { %v636_v9 = vpack.c.bf16 %v67_v7, %v66_v6  ;;  %604 = vmatprep.subr.bf16.mxu0 %v603_v4  ;;  %v37_v14 = vld [vmem:[%s1064_s1 + $0x18] sm:$0xff]  ;;  %v68_v15 = vld [vmem:[%s1064_s1 + $0x110] sm:$0xff]  ;;  %v54_v19 = vld [vmem:[%s1064_s1 + $0xa0] sm:$0xff] }
   0x5   :  { %v69_v16 = vld [vmem:[%s1064_s1 + $0x118] sm:$0xff]  ;;  %606 = vmatpush3.bf16.msra.mxu0 %v605_v8  ;;  %v609_v17 = vpack.c.bf16 %v37_v14, %v36_v12  ;;  %v55_v20 = vld [vmem:[%s1064_s1 + $0xa8] sm:$0xff]  ;;  %v38_v21 = vld [vmem:[%s1064_s1 + $0x20] sm:$0xff] }
   0x6   :  { %637 = vmatpush1.bf16.msra.mxu1 %v636_v9  ;;  %v639_v18 = vpack.c.bf16 %v69_v16, %v68_v15  ;;  %608 = vmatprep.subr.bf16.mxu0 %v607_v13  ;;  %v611_v22 = vpack.c.bf16 %v55_v20, %v54_v19  ;;  %v39_v23 = vld [vmem:[%s1064_s1 + $0x28] sm:$0xff]  ;;  %v70_v24 = vld [vmem:[%s1064_s1 + $0x120] sm:$0xff]  ;;  %v56_v26 = vld [vmem:[%s1064_s1 + $0xb0] sm:$0xff] }
   0x7   :  { %638 = vmatprep.subr.bf16.mxu1 %v727_v2  ;;  %v71_v25 = vld [vmem:[%s1064_s1 + $0x128] sm:$0xff]  ;;  %v57_v27 = vld [vmem:[%s1064_s1 + $0xb8] sm:$0xff]  ;;  %v613_v28 = vpack.c.bf16 %v39_v23, %v38_v21  ;;  %v40_v30 = vld [vmem:[%s1064_s1 + $0x30] sm:$0xff] }
   0x8   :  { %v642_v29 = vpack.c.bf16 %v71_v25, %v70_v24  ;;  %v615_v31 = vpack.c.bf16 %v57_v27, %v56_v26  ;;  %v41_v32 = vld [vmem:[%s1064_s1 + $0x38] sm:$0xff]  ;;  %v72_v33 = vld [vmem:[%s1064_s1 + $0x130] sm:$0xff]  ;;  %v58_v35 = vld [vmem:[%s1064_s1 + $0xc0] sm:$0xff] }
   0x9   :  { %610 = vmatpush3.bf16.msra.mxu0 %v609_v17  ;;  %v73_v34 = vld [vmem:[%s1064_s1 + $0x138] sm:$0xff]  ;;  %v59_v36 = vld [vmem:[%s1064_s1 + $0xc8] sm:$0xff]  ;;  %v617_v37 = vpack.c.bf16 %v41_v32, %v40_v30  ;;  %v42_v39 = vld [vmem:[%s1064_s1 + $0x40] sm:$0xff] }
   0xa   :  { %640 = vmatpush1.bf16.msra.mxu1 %v639_v18  ;;  %612 = vmatprep.subr.bf16.mxu0 %v611_v22  ;;  %v645_v38 = vpack.c.bf16 %v73_v34, %v72_v33  ;;  %v619_v40 = vpack.c.bf16 %v59_v36, %v58_v35  ;;  %v43_v41 = vld [vmem:[%s1064_s1 + $0x48] sm:$0xff]  ;;  %v74_v42 = vld [vmem:[%s1064_s1 + $0x140] sm:$0xff]  ;;  %v60_v44 = vld [vmem:[%s1064_s1 + $0xd0] sm:$0xff] }
   0xb   :  { %641 = vmatprep.subr.bf16.mxu1 %v727_v2  ;;  %v75_v43 = vld [vmem:[%s1064_s1 + $0x148] sm:$0xff]  ;;  %v61_v45 = vld [vmem:[%s1064_s1 + $0xd8] sm:$0xff]  ;;  %v621_v46 = vpack.c.bf16 %v43_v41, %v42_v39  ;;  %v44_v48 = vld [vmem:[%s1064_s1 + $0x50] sm:$0xff] }
   0xc   :  { %v648_v47 = vpack.c.bf16 %v75_v43, %v74_v42  ;;  %v45_v49 = vld [vmem:[%s1064_s1 + $0x58] sm:$0xff]  ;;  %v27_v50 = vld [vmem:[%s1065_s0 + $0x8] sm:$0xff]  ;;  %v623_v51 = vpack.c.bf16 %v61_v45, %v60_v44  ;;  %v76_v52 = vld [vmem:[%s1064_s1 + $0x150] sm:$0xff] }
   0xd   :  { %614 = vmatpush3.bf16.msra.mxu0 %v613_v28  ;;  %v77_v53 = vld [vmem:[%s1064_s1 + $0x158] sm:$0xff]  ;;  %v62_v55 = vld [vmem:[%s1064_s1 + $0xe0] sm:$0xff]  ;;  %v63_v56 = vld [vmem:[%s1064_s1 + $0xe8] sm:$0xff]  ;;  %162 = vmatprep.mubr.f32.mxu0 %v27_v50  ;;  %v625_v57 = vpack.c.bf16 %v45_v49, %v44_v48 }
   0xe   :  { %643 = vmatpush1.bf16.msra.mxu1 %v642_v29  ;;  %616 = vmatprep.subr.bf16.mxu0 %v615_v31  ;;  %v29_v54 = vld [vmem:[%s1065_s0 + $0x18] sm:$0xff]  ;;  %v651_v58 = vpack.c.bf16 %v77_v53, %v76_v52  ;;  %v46_v59 = vld [vmem:[%s1064_s1 + $0x60] sm:$0xff]  ;;  %v627_v60 = vpack.c.bf16 %v63_v56, %v62_v55  ;;  %v47_v61 = vld [vmem:[%s1064_s1 + $0x68] sm:$0xff] }
   0xf   :  { %644 = vmatprep.subr.bf16.mxu1 %v727_v2  ;;  %455 = vmatprep.mubr.msk.f32.mxu1 %vm91_vm0, %v29_v54  ;;  %v78_v62 = vld [vmem:[%s1064_s1 + $0x160] sm:$0xff]  ;;  %v79_v63 = vld [vmem:[%s1064_s1 + $0x168] sm:$0xff]  ;;  %v64_v0 = vld [vmem:[%s1064_s1 + $0xf0] sm:$0xff]  ;;  %v629_v3 = vpack.c.bf16 %v47_v61, %v46_v59 }
  0x10   :  { %v65_v1 = vld [vmem:[%s1064_s1 + $0xf8] sm:$0xff]  ;;  %v654_v4 = vpack.c.bf16 %v79_v63, %v78_v62  ;;  %v48_v5 = vld [vmem:[%s1064_s1 + $0x70] sm:$0xff]  ;;  %v250_v10 = vld [vmem:[%s1066_s3] sm:$0xff] }
  0x11   :  { %618 = vmatpush3.bf16.msra.mxu0 %v617_v37  ;;  %v631_v6 = vpack.c.bf16 %v65_v1, %v64_v0  ;;  %v49_v7 = vld [vmem:[%s1064_s1 + $0x78] sm:$0xff]  ;;  %v80_v8 = vld [vmem:[%s1064_s1 + $0x170] sm:$0xff]  ;;  %v251_v11 = vld [vmem:[%s1066_s3 + $0x8] sm:$0xff] }
  0x12   :  { %646 = vmatpush1.bf16.msra.mxu1 %v645_v38  ;;  %620 = vmatprep.subr.bf16.mxu0 %v619_v40  ;;  %v81_v9 = vld [vmem:[%s1064_s1 + $0x178] sm:$0xff]  ;;  %v633_v12 = vpack.c.bf16 %v49_v7, %v48_v5  ;;  %v82_v14 = vld [vmem:[%s1064_s1 + $0x180] sm:$0xff]  ;;  %v83_v15 = vld [vmem:[%s1064_s1 + $0x188] sm:$0xff]  ;;  %v662_v16 = vpack.c.bf16 %v251_v11, %v250_v10 }
  0x13   :  { %647 = vmatprep.subr.bf16.mxu1 %v727_v2  ;;  %v657_v13 = vpack.c.bf16 %v81_v9, %v80_v8  ;;  %v252_v17 = vld [vmem:[%s1066_s3 + $0x10] sm:$0xff]  ;;  %v253_v18 = vld [vmem:[%s1066_s3 + $0x18] sm:$0xff]  ;;  %v26_v19 = vld [vmem:[%s1065_s0] sm:$0xff]  ;;  %v660_v20 = vpack.c.bf16 %v83_v15, %v82_v14 }
  0x14   :  { %v31_v21 = vld [vmem:[%s1065_s0 + $0x28] sm:$0xff]  ;;  %v666_v22 = vpack.c.bf16 %v253_v18, %v252_v17  ;;  %v254_v23 = vld [vmem:[%s1066_s3 + $0x20] sm:$0xff]  ;;  %v28_v25 = vld [vmem:[%s1065_s0 + $0x10] sm:$0xff] }
  0x15   :  { %622 = vmatpush3.bf16.msra.mxu0 %v621_v46  ;;  %v255_v24 = vld [vmem:[%s1066_s3 + $0x28] sm:$0xff]  ;;  %v33_v26 = vld [vmem:[%s1065_s0 + $0x38] sm:$0xff]  ;;  %v256_v28 = vld [vmem:[%s1066_s3 + $0x30] sm:$0xff] }
  0x16   :  { %649 = vmatpush1.bf16.msra.mxu1 %v648_v47  ;;  %624 = vmatprep.subr.bf16.mxu0 %v623_v51  ;;  %v670_v27 = vpack.c.bf16 %v255_v24, %v254_v23  ;;  %v257_v29 = vld [vmem:[%s1066_s3 + $0x38] sm:$0xff]  ;;  %v32_v30 = vld [vmem:[%s1065_s0 + $0x30] sm:$0xff]  ;;  %v258_v32 = vld [vmem:[%s1066_s3 + $0x40] sm:$0xff] }
  0x17   :  { %650 = vmatprep.subr.bf16.mxu1 %v727_v2  ;;  %v674_v31 = vpack.c.bf16 %v257_v29, %v256_v28  ;;  %v259_v33 = vld [vmem:[%s1066_s3 + $0x48] sm:$0xff]  ;;  %v260_v35 = vld [vmem:[%s1066_s3 + $0x50] sm:$0xff]  ;;  %v261_v36 = vld [vmem:[%s1066_s3 + $0x58] sm:$0xff] }
  0x18   :  { %v678_v34 = vpack.c.bf16 %v259_v33, %v258_v32  ;;  %v682_v37 = vpack.c.bf16 %v261_v36, %v260_v35  ;;  %v262_v38 = vld [vmem:[%s1066_s3 + $0x60] sm:$0xff]  ;;  %v263_v39 = vld [vmem:[%s1066_s3 + $0x68] sm:$0xff]  ;;  %v264_v41 = vld [vmem:[%s1066_s3 + $0x70] sm:$0xff] }
  0x19   :  { %626 = vmatpush3.bf16.msra.mxu0 %v625_v57  ;;  %v686_v40 = vpack.c.bf16 %v263_v39, %v262_v38  ;;  %v265_v42 = vld [vmem:[%s1066_s3 + $0x78] sm:$0xff]  ;;  %v350_v44 = vld [vmem:[%s1067_s5] sm:$0xff]  ;;  %v351_v45 = vld [vmem:[%s1067_s5 + $0x8] sm:$0xff] }
  0x1a   :  { %652 = vmatpush1.bf16.msra.mxu1 %v651_v58  ;;  %628 = vmatprep.subr.bf16.mxu0 %v627_v60  ;;  %v690_v43 = vpack.c.bf16 %v265_v42, %v264_v41  ;;  %v352_v46 = vld [vmem:[%s1067_s5 + $0x10] sm:$0xff]  ;;  %v694_v47 = vpack.c.bf16 %v351_v45, %v350_v44  ;;  %v353_v48 = vld [vmem:[%s1067_s5 + $0x18] sm:$0xff]  ;;  %v354_v50 = vld [vmem:[%s1067_s5 + $0x20] sm:$0xff] }
  0x1b   :  { %653 = vmatprep.subr.bf16.mxu1 %v727_v2  ;;  %v698_v49 = vpack.c.bf16 %v353_v48, %v352_v46  ;;  %v355_v51 = vld [vmem:[%s1067_s5 + $0x28] sm:$0xff]  ;;  %v356_v53 = vld [vmem:[%s1067_s5 + $0x30] sm:$0xff]  ;;  %v357_v54 = vld [vmem:[%s1067_s5 + $0x38] sm:$0xff] }
  0x1c   :  { %v702_v52 = vpack.c.bf16 %v355_v51, %v354_v50  ;;  %v706_v55 = vpack.c.bf16 %v357_v54, %v356_v53  ;;  %v358_v56 = vld [vmem:[%s1067_s5 + $0x40] sm:$0xff]  ;;  %v359_v57 = vld [vmem:[%s1067_s5 + $0x48] sm:$0xff]  ;;  %v360_v59 = vld [vmem:[%s1067_s5 + $0x50] sm:$0xff] }
  0x1d   :  { %630 = vmatpush3.bf16.msra.mxu0 %v629_v3  ;;  %v710_v58 = vpack.c.bf16 %v359_v57, %v358_v56  ;;  %v361_v60 = vld [vmem:[%s1067_s5 + $0x58] sm:$0xff]  ;;  %v362_v62 = vld [vmem:[%s1067_s5 + $0x60] sm:$0xff]  ;;  %v363_v63 = vld [vmem:[%s1067_s5 + $0x68] sm:$0xff] }
  0x1e   :  { %655 = vmatpush1.bf16.msra.mxu1 %v654_v4  ;;  %632 = vmatprep.subr.bf16.mxu0 %v631_v6  ;;  %v714_v61 = vpack.c.bf16 %v361_v60, %v360_v59  ;;  %v718_v0 = vpack.c.bf16 %v363_v63, %v362_v62  ;;  %v454_v4 = vld [vmem:[%s1068_s2] ss:$0 sm:$0xff] }
  0x1f   :  { %656 = vmatprep.subr.bf16.mxu1 %v727_v2  ;;  %v458_v28 = vld [vmem:[%s1070_s6] ss:$0 sm:$0xff] }
  0x21   :  { %634 = vmatpush3.bf16.msra.mxu0 %v633_v12 }
  0x22   :  { %658 = vmatpush1.bf16.msra.mxu1 %v657_v13  ;;  %663 = vmatprep.subr.bf16.mxu0 %v662_v16 }
  0x23   :  { %659 = vmatprep.subr.bf16.mxu1 %v727_v2  ;;  %v30_v2 = vld [vmem:[%s1065_s0 + $0x20] sm:$0xff] }
  0x24   :  { %163 = vmatmul.mubr.f32.vlgmr.msra.gmra.mrb[0].mxu0 %v26_v19  ;;  %v364_v19 = vld [vmem:[%s1067_s5 + $0x70] sm:$0xff] }
  0x25   :  { %167 = vmatprep.mubr.f32.mxu0 %v31_v21  ;;  %665 = vmatpush3.bf16.msra.mxu0 %v662_v16 }
  0x26   :  { %661 = vmatpush1.bf16.msra.mxu1 %v660_v20  ;;  %667 = vmatprep.subr.bf16.mxu0 %v666_v22  ;;  %v365_v20 = vld [vmem:[%s1067_s5 + $0x78] sm:$0xff] }
  0x27   :  { %695 = vmatprep.subr.bf16.mxu1 %v694_v47  ;;  %v722_v21 = vpack.c.bf16 %v365_v20, %v364_v19 }
  0x28   :  { %168 = vmatmul.mubr.f32.gmra.mrb[2].mxu0 %v30_v2 }
  0x29   :  { %238 = vmatmul.mubr.f32.vlgmr.msra.gmra.mrb[0].mxu1 %v28_v25  ;;  %669 = vmatpush3.bf16.msra.mxu0 %v666_v22  ;;  %v457_v22 = vld [vmem:[%s1069_s4] ss:$0 sm:$0xff] }
  0x2a   :  { %456 = vmatprep.mubr.msk.f32.mxu1 %vm91_vm0, %v33_v26  ;;  %671 = vmatprep.subr.bf16.mxu0 %v670_v27 }
  0x2b   :  { %697 = vmatpush3.bf16.msra.mxu1 %v694_v47 }
  0x2c   :  { %699 = vmatprep.subr.bf16.mxu1 %v698_v49 }
  0x2d   :  { %243 = vmatmul.mubr.f32.gmra.mrb[2].mxu1 %v32_v30  ;;  %673 = vmatpush3.bf16.msra.mxu0 %v670_v27 }
  0x2e   :  { %675 = vmatprep.subr.bf16.mxu0 %v674_v31 }
  0x2f   :  { %701 = vmatpush3.bf16.msra.mxu1 %v698_v49 }
  0x30   :  { %703 = vmatprep.subr.bf16.mxu1 %v702_v52 }
  0x31   :  { %677 = vmatpush3.bf16.msra.mxu0 %v674_v31 }
  0x32   :  { %679 = vmatprep.subr.bf16.mxu0 %v678_v34 }
  0x33   :  { %705 = vmatpush3.bf16.msra.mxu1 %v702_v52 }
  0x34   :  { %707 = vmatprep.subr.bf16.mxu1 %v706_v55 }
  0x35   :  { %681 = vmatpush3.bf16.msra.mxu0 %v678_v34 }
  0x36   :  { %683 = vmatprep.subr.bf16.mxu0 %v682_v37 }
  0x37   :  { %709 = vmatpush3.bf16.msra.mxu1 %v706_v55 }
  0x38   :  { %711 = vmatprep.subr.bf16.mxu1 %v710_v58 }
  0x39   :  { %685 = vmatpush3.bf16.msra.mxu0 %v682_v37 }
  0x3a   :  { %687 = vmatprep.subr.bf16.mxu0 %v686_v40 }
  0x3b   :  { %713 = vmatpush3.bf16.msra.mxu1 %v710_v58 }
  0x3c   :  { %715 = vmatprep.subr.bf16.mxu1 %v714_v61 }
  0x3d   :  { %689 = vmatpush3.bf16.msra.mxu0 %v686_v40 }
  0x3e   :  { %691 = vmatprep.subr.bf16.mxu0 %v690_v43 }
  0x3f   :  { %717 = vmatpush3.bf16.msra.mxu1 %v714_v61 }
  0x40   :  { %719 = vmatprep.subr.bf16.mxu1 %v718_v0 }
  0x41   :  { %693 = vmatpush3.bf16.msra.mxu0 %v690_v43 }
  0x43   :  { %721 = vmatpush3.bf16.msra.mxu1 %v718_v0 }
  0x44   :  { %723 = vmatprep.subr.bf16.mxu1 %v722_v21 }
  0x47   :  { %725 = vmatpush3.bf16.msra.mxu1 %v722_v21 }
  0xf7   :  { %v491_v1 = vpop.f32.mrb[0].mxu0 }
  0xf8   :  { %v492_v3 = vpop.f32.mrb[1].mxu0 }
  0xf9   :  { %v493_v5 = vadd.f32 %v492_v3, %v491_v1 }
  0xfb   :  { %v494_v6 = vpop.f32.mrb[2].mxu0  ;;  %v165_v7 = vadd.f32 %v493_v5, %v454_v4 }
  0xfc   :  { %v239_v8 = vpop.f32.mrb[0].mxu1  ;;  %v495_v9 = vpop.f32.mrb[3].mxu0 }
  0xfd   :  { %v241_v10 = vpop.f32.mrb[1].mxu1  ;;  %v240_v11 = vadd.f32 %v239_v8, %v165_v7  ;;  %v496_v12 = vadd.f32 %v495_v9, %v494_v6 }
  0xff   :  { %v248_v13 = vmax.f32 %v240_v11, 0.0  ;;  %v170_v14 = vadd.f32 %v496_v12, %v454_v4 }
 0x100   :  { %v244_v15 = vpop.f32.mrb[2].mxu1 }
 0x101   :  { %v246_v16 = vpop.f32.mrb[3].mxu1  ;;  %v245_v17 = vadd.f32 %v244_v15, %v170_v14  ;;  %565 = vmatprep.mubr.f32.mxu0 %v248_v13 }
 0x103   :  { %v249_v18 = vmax.f32 %v245_v17, 0.0 }
 0x105   :  { %566 = vmatmul.mubr.f32.vlgmr.msra.gmra.mrb[4].mxu0 %v249_v18 }
 0x1d8   :  { %v567_v23 = vpop.f32.mrb[4].mxu0 }
 0x1d9   :  { %v345_v24 = vadd.f32 %v567_v23, %v457_v22  ;;  %v339_v2 = vpop.f32.mrb[5].mxu0 }
 0x1da   :  { %v340_v25 = vadd.f32 %v457_v22, %v339_v2 }
 0x1db   :  { %v349_v27 = vmax.f32 %v345_v24, 0.0 }
 0x1dc   :  { %v348_v26 = vmax.f32 %v340_v25, 0.0 }
 0x1de   :  { %600 = vmatprep.mubr.f32.mxu1 %v348_v26 }
 0x1df   :  { %601 = vmatmul.mubr.f32.vlgmr.msra.gmra.mrb[4].mxu1 %v349_v27 }
 0x2b2   :  { %v602_v29 = vpop.f32.mrb[4].mxu1 }
 0x2b3   :  { %v445_v30 = vadd.f32 %v602_v29, %v458_v28  ;;  %v439_v31 = vpop.f32.mrb[5].mxu1 }
 0x2b4   :  { %v440_v32 = vadd.f32 %v458_v28, %v439_v31 }
 0x2b5   :  { %449 = vst [vmem:[%s1071_s7 + $0x8] sm:$0xff] %v445_v30 }
 0x2b6   :  { %448 = vst [vmem:[%s1071_s7] sm:$0xff] %v440_v32 }

</bundles_post_ra>
